<compile_context>
chip_gen: v7x
topology: tpu7x:2x2x1
jax: 0.10.0
libtpu: 0.0.40
codegen_flags: <defaults>
</compile_context>

<pallas_src>
import functools

import jax
import jax.numpy as jnp
from jax.experimental import pallas as pl
from jax.experimental.pallas import tpu as pltpu


def temporal_attn_kernel(x_ref, wq_ref, wk_ref, wv_ref, bq_ref, bk_ref, bv_ref,
                         wo_ref, bo_ref, gamma_ref, beta_ref, o_ref, *, eps):
    """One grid step = nb whole sequences, presented as (nb, S, D)."""
    nb, S, D = x_ref.shape
    H = wq_ref.shape[0]
    hd = D // H
    rows = nb * S
    scale = 1.0 / (hd ** 0.5)

    # (nb, S, D) -> (rows, D) is a free leading-dim collapse when S % 8 == 0 (S=8 here).
    x = x_ref[...].reshape(rows, D).astype(jnp.float32)
    xb = x.astype(jnp.bfloat16)

    # Residual + out-projection bias form the accumulator's initial value.
    y = x + bo_ref[...]                                                  # (rows, D)

    # Statically unrolled per-head attention.  Every operand below is lane-aligned:
    # no hd-wide lane slices, no concatenates, no head transposes (perf review item on
    # XLU relayouts).  MXU fill is low (K=32 / K=8) but the MXU has enormous slack here.
    for h in range(H):
        q = (jnp.dot(xb, wq_ref[h], preferred_element_type=jnp.float32)
             + bq_ref[h]).reshape(nb, S, hd)                             # (nb, S, hd)
        k = (jnp.dot(xb, wk_ref[h], preferred_element_type=jnp.float32)
             + bk_ref[h]).reshape(nb, S, hd)
        v = (jnp.dot(xb, wv_ref[h], preferred_element_type=jnp.float32)
             + bv_ref[h]).reshape(nb, S, hd)

        # Scores: single batched matmul with one leading batch dim (no k.T materialized).
        s = jnp.einsum("nsd,ntd->nst",
                       q.astype(jnp.bfloat16), k.astype(jnp.bfloat16),
                       preferred_element_type=jnp.float32) * scale       # (nb, S, S)
        s = s - jnp.max(s, axis=-1, keepdims=True)
        p = jnp.exp(s)
        # Softmax normalization via EUP approx reciprocal instead of a VALU divide.
        p = p * pl.reciprocal(jnp.sum(p, axis=-1, keepdims=True), approx=True)
        # TODO(synk): attention-weight dropout is identity here (eval mode).
        ctx = jnp.einsum("nst,ntd->nsd",
                         p.astype(jnp.bfloat16), v.astype(jnp.bfloat16),
                         preferred_element_type=jnp.float32)             # (nb, S, hd)

        # Per-head slice of the output projection accumulates directly into the
        # (rows, D) result, so heads never need to be re-merged onto the lane axis.
        y = y + jnp.dot(ctx.reshape(rows, hd).astype(jnp.bfloat16), wo_ref[h],
                        preferred_element_type=jnp.float32)

    # LayerNorm (biased variance, eps=1e-5).  All elementwise math stays f32 (v5e-safe);
    # rsqrt runs on the EUP.
    mean = jnp.mean(y, axis=-1, keepdims=True)
    yc = y - mean
    var = jnp.mean(yc * yc, axis=-1, keepdims=True)
    y = yc * jax.lax.rsqrt(var + eps)
    y = y * gamma_ref[...] + beta_ref[...]

    # TODO(synk): at D=32 this is a 32-lane (masked) store; a lane-dense (rows/4, 128)
    # output slab only pays once the kernel becomes store-bound at much larger N*S.
    o_ref[...] = y.reshape(nb, S, D).astype(o_ref.dtype)


def _is_v7x():
    try:
        kind = jax.devices()[0].device_kind.lower()
    except Exception:
        return False
    return any(t in kind for t in ("v7", "7x", "tpu7"))


def _choose_num_blocks(N, S):
    """Work-aware grid sizing: 1 block for small problems; VMEM-sized blocks otherwise."""
    rows_total = N * S
    MIN_SPLIT_ROWS = 512          # below this, a grid step is dominated by ~0.35us fixed overhead
    if rows_total < 2 * MIN_SPLIT_ROWS or N <= 1:
        return 1
    v7x = _is_v7x()
    rows_cap = 2048 if v7x else 4096   # VMEM-derived cap (v7x: 64 MiB physical / 32 MiB default scoped)
    nb = max(1, rows_cap // S)
    num_blocks = pl.cdiv(N, nb)
    if v7x and num_blocks > 1 and num_blocks % 2 == 1:
        # Even block count -> balanced across v7x's two TensorCores, but only if each
        # core's share still exceeds the per-step-overhead threshold.
        cand = num_blocks + 1
        if pl.cdiv(N, cand) * S >= MIN_SPLIT_ROWS:
            num_blocks = cand
    return min(num_blocks, N)


def temporal_transformer_layer(x, params, num_heads=4):
    """x: (B, S, A, D) -> (B, S, A, D), matching the PyTorch module's forward (eval mode)."""
    B, S, A, D = x.shape
    assert D % num_heads == 0, "input_dim must be divisible by num_heads"
    hd = D // num_heads
    N = B * A

    # (B, S, A, D) -> (B, A, S, D) -> (N, S, D): one fused XLA copy in (and one out below).
    xr = jnp.transpose(x, (0, 2, 1, 3)).reshape(N, S, D)

    num_blocks = _choose_num_blocks(N, S)
    nb = pl.cdiv(N, num_blocks)   # sequences per block; a ragged last block is masked by Pallas
    rows_per_block = nb * S

    # Per-head weight slabs (built once, outside the kernel) so the kernel never slices
    # lanes.  Projection weights go to bf16 for the MXU; biases / LN params stay f32.
    w_in = params["in_proj_weight"]        # (3D, D), PyTorch orientation (out, in)
    b_in = params["in_proj_bias"]          # (3D,)

    def head_w(block):                     # (D, D) (out, in) -> (H, D_in, hd)
        return block.reshape(num_heads, hd, D).transpose(0, 2, 1).astype(jnp.bfloat16)

    def head_b(vec):                       # (D,) -> (H, 1, hd)
        return vec.reshape(num_heads, 1, hd).astype(jnp.float32)

    wq, wk, wv = head_w(w_in[0 * D:1 * D]), head_w(w_in[1 * D:2 * D]), head_w(w_in[2 * D:3 * D])
    bq, bk, bv = head_b(b_in[0 * D:1 * D]), head_b(b_in[1 * D:2 * D]), head_b(b_in[2 * D:3 * D])
    # out_proj.weight is (D_out, D_in=H*hd): per-head slab (H, hd, D_out).
    wo = params["out_proj_weight"].reshape(D, num_heads, hd).transpose(1, 2, 0).astype(jnp.bfloat16)
    bo = params["out_proj_bias"].reshape(1, D).astype(jnp.float32)
    gamma = params["ln_weight"].reshape(1, D).astype(jnp.float32)
    beta = params["ln_bias"].reshape(1, D).astype(jnp.float32)

    kernel = functools.partial(temporal_attn_kernel, eps=1e-5)

    rep3 = lambda i: (0, 0, 0)             # replicated (whole-array) weight blocks
    rep2 = lambda i: (0, 0)

    compiler_kwargs = dict(dimension_semantics=("parallel",))
    if rows_per_block >= 1024:
        # Only large blocks need more than the default scoped-VMEM budget; v7x has
        # 64 MiB physical VMEM vs 128 MiB on v5e/v6e.
        compiler_kwargs["vmem_limit_bytes"] = (48 << 20) if _is_v7x() else (96 << 20)

    out3 = pl.pallas_call(
        kernel,
        out_shape=jax.ShapeDtypeStruct((N, S, D), x.dtype),
        grid_spec=pltpu.PrefetchScalarGridSpec(
            num_scalar_prefetch=0,
            grid=(num_blocks,),
            in_specs=[
                pl.BlockSpec((nb, S, D), lambda i: (i, 0, 0)),        # x sequences
                pl.BlockSpec((num_heads, D, hd), rep3),               # Wq per head (bf16)
                pl.BlockSpec((num_heads, D, hd), rep3),               # Wk per head (bf16)
                pl.BlockSpec((num_heads, D, hd), rep3),               # Wv per head (bf16)
                pl.BlockSpec((num_heads, 1, hd), rep3),               # bq per head
                pl.BlockSpec((num_heads, 1, hd), rep3),               # bk per head
                pl.BlockSpec((num_heads, 1, hd), rep3),               # bv per head
                pl.BlockSpec((num_heads, hd, D), rep3),               # Wo per head (bf16)
                pl.BlockSpec((1, D), rep2),                           # out-proj bias
                pl.BlockSpec((1, D), rep2),                           # LN gamma
                pl.BlockSpec((1, D), rep2),                           # LN beta
            ],
            out_specs=pl.BlockSpec((nb, S, D), lambda i: (i, 0, 0)),
        ),
        compiler_params=pltpu.CompilerParams(**compiler_kwargs),
    )(xr, wq, wk, wv, bq, bk, bv, wo, bo, gamma, beta)

    out = out3.reshape(B, A, S, D)
    return jnp.transpose(out, (0, 2, 1, 3))                           # back to (B, S, A, D)


def reference_layer(x, params, num_heads=4, eps=1e-5):
    """Pure-JAX f32 reference replicating PyTorch nn.MultiheadAttention + LayerNorm (eval)."""
    B, S, A, D = x.shape
    hd = D // num_heads
    xr = jnp.transpose(x, (0, 2, 1, 3)).reshape(B * A, S, D)

    qkv = jnp.einsum("nsd,ed->nse", xr, params["in_proj_weight"]) + params["in_proj_bias"]
    q, k, v = qkv[..., :D], qkv[..., D:2 * D], qkv[..., 2 * D:]

    def split(t):  # (N, S, D) -> (N, H, S, hd)
        return jnp.transpose(t.reshape(B * A, S, num_heads, hd), (0, 2, 1, 3))

    q, k, v = split(q), split(k), split(v)
    s = jnp.einsum("nhqd,nhkd->nhqk", q, k) / jnp.sqrt(jnp.float32(hd))
    p = jax.nn.softmax(s, axis=-1)
    o = jnp.einsum("nhqk,nhkd->nhqd", p, v)
    o = jnp.transpose(o, (0, 2, 1, 3)).reshape(B * A, S, D)
    attn_out = jnp.einsum("nsd,ed->nse", o, params["out_proj_weight"]) + params["out_proj_bias"]

    y = xr + attn_out
    mean = jnp.mean(y, axis=-1, keepdims=True)
    var = jnp.mean((y - mean) ** 2, axis=-1, keepdims=True)
    y = (y - mean) / jnp.sqrt(var + eps)
    y = y * params["ln_weight"] + params["ln_bias"]
    y = y.reshape(B, A, S, D)
    return jnp.transpose(y, (0, 2, 1, 3))


def init_params(key, input_dim):
    """Deterministic synthetic parameters with PyTorch nn.MultiheadAttention shapes."""
    k1, k2, k3, k4 = jax.random.split(key, 4)
    scale = 1.0 / jnp.sqrt(jnp.float32(input_dim))
    return {
        # PyTorch orientation: in_proj_weight is (3E, E), out_proj.weight is (E, E)
        "in_proj_weight": jax.random.normal(k1, (3 * input_dim, input_dim), jnp.float32) * scale,
        "in_proj_bias": jax.random.normal(k2, (3 * input_dim,), jnp.float32) * 0.02,
        "out_proj_weight": jax.random.normal(k3, (input_dim, input_dim), jnp.float32) * scale,
        "out_proj_bias": jax.random.normal(k4, (input_dim,), jnp.float32) * 0.02,
        "ln_weight": jnp.ones((input_dim,), jnp.float32),
        "ln_bias": jnp.zeros((input_dim,), jnp.float32),
    }


if __name__ == "__main__":
    B, S, A, D = 2, 8, 3, 32   # batch, seq_length, num_agents, input_dim
    num_heads = 4

    key = jax.random.PRNGKey(0)
    kx, kp = jax.random.split(key)
    x = jax.random.normal(kx, (B, S, A, D), jnp.float32)
    params = init_params(kp, D)

    out = temporal_transformer_layer(x, params, num_heads=num_heads)
    out = jax.block_until_ready(out)

    ref = jax.block_until_ready(reference_layer(x, params, num_heads=num_heads))
    assert out.shape == (B, S, A, D)
    # bf16 MXU operands (f32 accumulation) vs f32 reference -> slightly looser tolerance.
    assert jnp.allclose(out, ref, atol=3e-2, rtol=3e-2), "mismatch vs reference"

    print("KERNEL_OK")
</pallas_src>

<mosaic_0001>
module attributes {stable_mosaic.version = 11 : i64} {
  func.func @temporal_attn_kernel(%arg0: i32, %arg1: memref<6x8x32xf32, #tpu.memory_space<vmem>>, %arg2: memref<4x32x8xbf16, #tpu.memory_space<vmem>>, %arg3: memref<4x32x8xbf16, #tpu.memory_space<vmem>>, %arg4: memref<4x32x8xbf16, #tpu.memory_space<vmem>>, %arg5: memref<4x1x8xf32, #tpu.memory_space<vmem>>, %arg6: memref<4x1x8xf32, #tpu.memory_space<vmem>>, %arg7: memref<4x1x8xf32, #tpu.memory_space<vmem>>, %arg8: memref<4x8x32xbf16, #tpu.memory_space<vmem>>, %arg9: memref<1x32xf32, #tpu.memory_space<vmem>>, %arg10: memref<1x32xf32, #tpu.memory_space<vmem>>, %arg11: memref<1x32xf32, #tpu.memory_space<vmem>>, %arg12: memref<6x8x32xf32, #tpu.memory_space<vmem>>) attributes {dimension_semantics = [#tpu.dimension_semantics<parallel>], iteration_bounds = array<i64: 1>, scalar_prefetch = 0 : i64, scratch_operands = 0 : i64, tpu.core_type = #tpu.core_type<tc>, window_params = [{transform_indices = @transform_0, window_bounds = array<i64: 6, 8, 32>}, {pipeline_mode = #tpu.pipeline_mode<synchronous>, transform_indices = @transform_1, window_bounds = array<i64: 4, 32, 8>}, {pipeline_mode = #tpu.pipeline_mode<synchronous>, transform_indices = @transform_2, window_bounds = array<i64: 4, 32, 8>}, {pipeline_mode = #tpu.pipeline_mode<synchronous>, transform_indices = @transform_3, window_bounds = array<i64: 4, 32, 8>}, {pipeline_mode = #tpu.pipeline_mode<synchronous>, transform_indices = @transform_4, window_bounds = array<i64: 4, 1, 8>}, {pipeline_mode = #tpu.pipeline_mode<synchronous>, transform_indices = @transform_5, window_bounds = array<i64: 4, 1, 8>}, {pipeline_mode = #tpu.pipeline_mode<synchronous>, transform_indices = @transform_6, window_bounds = array<i64: 4, 1, 8>}, {pipeline_mode = #tpu.pipeline_mode<synchronous>, transform_indices = @transform_7, window_bounds = array<i64: 4, 8, 32>}, {pipeline_mode = #tpu.pipeline_mode<synchronous>, transform_indices = @transform_8, window_bounds = array<i64: 1, 32>}, {pipeline_mode = #tpu.pipeline_mode<synchronous>, transform_indices = @transform_9, window_bounds = array<i64: 1, 32>}, {pipeline_mode = #tpu.pipeline_mode<synchronous>, transform_indices = @transform_10, window_bounds = array<i64: 1, 32>}, {transform_indices = @transform_11, window_bounds = array<i64: 6, 8, 32>}]} {
    %c0 = arith.constant 0 : index
    %c0_0 = arith.constant 0 : index
    %c0_1 = arith.constant 0 : index
    %0 = vector.load %arg1[%c0, %c0_0, %c0_1] : memref<6x8x32xf32, #tpu.memory_space<vmem>>, vector<6x8x32xf32>
    %1 = vector.shape_cast %0 : vector<6x8x32xf32> to vector<48x32xf32>
    %2 = arith.truncf %1 : vector<48x32xf32> to vector<48x32xbf16>
    %c0_2 = arith.constant 0 : index
    %c0_3 = arith.constant 0 : index
    %3 = vector.load %arg9[%c0_2, %c0_3] : memref<1x32xf32, #tpu.memory_space<vmem>>, vector<1x32xf32>
    %4 = vector.broadcast %3 : vector<1x32xf32> to vector<48x32xf32>
    %5 = arith.addf %1, %4 : vector<48x32xf32>
    %c0_4 = arith.constant 0 : index
    %c0_5 = arith.constant 0 : index
    %c0_6 = arith.constant 0 : index
    %6 = vector.load %arg2[%c0_4, %c0_5, %c0_6] : memref<4x32x8xbf16, #tpu.memory_space<vmem>>, vector<1x32x8xbf16>
    %7 = vector.shape_cast %6 : vector<1x32x8xbf16> to vector<32x8xbf16>
    %cst = arith.constant dense<0.000000e+00> : vector<48x8xf32>
    %8 = tpu.matmul %2, %7, %cst {dimension_numbers = #tpu.dot_dimension_numbers<[1], [0], [0], [1], [0, 0, 1, 1], [], []>} : vector<48x32xbf16>, vector<32x8xbf16>, vector<48x8xf32> -> vector<48x8xf32>
    %c0_7 = arith.constant 0 : index
    %c0_8 = arith.constant 0 : index
    %c0_9 = arith.constant 0 : index
    %9 = vector.load %arg5[%c0_7, %c0_8, %c0_9] : memref<4x1x8xf32, #tpu.memory_space<vmem>>, vector<1x1x8xf32>
    %10 = vector.shape_cast %9 : vector<1x1x8xf32> to vector<1x8xf32>
    %11 = vector.broadcast %10 : vector<1x8xf32> to vector<48x8xf32>
    %12 = arith.addf %8, %11 : vector<48x8xf32>
    %13 = vector.shape_cast %12 : vector<48x8xf32> to vector<6x8x8xf32>
    %c0_10 = arith.constant 0 : index
    %c0_11 = arith.constant 0 : index
    %c0_12 = arith.constant 0 : index
    %14 = vector.load %arg3[%c0_10, %c0_11, %c0_12] : memref<4x32x8xbf16, #tpu.memory_space<vmem>>, vector<1x32x8xbf16>
    %15 = vector.shape_cast %14 : vector<1x32x8xbf16> to vector<32x8xbf16>
    %cst_13 = arith.constant dense<0.000000e+00> : vector<48x8xf32>
    %16 = tpu.matmul %2, %15, %cst_13 {dimension_numbers = #tpu.dot_dimension_numbers<[1], [0], [0], [1], [0, 0, 1, 1], [], []>} : vector<48x32xbf16>, vector<32x8xbf16>, vector<48x8xf32> -> vector<48x8xf32>
    %c0_14 = arith.constant 0 : index
    %c0_15 = arith.constant 0 : index
    %c0_16 = arith.constant 0 : index
    %17 = vector.load %arg6[%c0_14, %c0_15, %c0_16] : memref<4x1x8xf32, #tpu.memory_space<vmem>>, vector<1x1x8xf32>
    %18 = vector.shape_cast %17 : vector<1x1x8xf32> to vector<1x8xf32>
    %19 = vector.broadcast %18 : vector<1x8xf32> to vector<48x8xf32>
    %20 = arith.addf %16, %19 : vector<48x8xf32>
    %21 = vector.shape_cast %20 : vector<48x8xf32> to vector<6x8x8xf32>
    %c0_17 = arith.constant 0 : index
    %c0_18 = arith.constant 0 : index
    %c0_19 = arith.constant 0 : index
    %22 = vector.load %arg4[%c0_17, %c0_18, %c0_19] : memref<4x32x8xbf16, #tpu.memory_space<vmem>>, vector<1x32x8xbf16>
    %23 = vector.shape_cast %22 : vector<1x32x8xbf16> to vector<32x8xbf16>
    %cst_20 = arith.constant dense<0.000000e+00> : vector<48x8xf32>
    %24 = tpu.matmul %2, %23, %cst_20 {dimension_numbers = #tpu.dot_dimension_numbers<[1], [0], [0], [1], [0, 0, 1, 1], [], []>} : vector<48x32xbf16>, vector<32x8xbf16>, vector<48x8xf32> -> vector<48x8xf32>
    %c0_21 = arith.constant 0 : index
    %c0_22 = arith.constant 0 : index
    %c0_23 = arith.constant 0 : index
    %25 = vector.load %arg7[%c0_21, %c0_22, %c0_23] : memref<4x1x8xf32, #tpu.memory_space<vmem>>, vector<1x1x8xf32>
    %26 = vector.shape_cast %25 : vector<1x1x8xf32> to vector<1x8xf32>
    %27 = vector.broadcast %26 : vector<1x8xf32> to vector<48x8xf32>
    %28 = arith.addf %24, %27 : vector<48x8xf32>
    %29 = vector.shape_cast %28 : vector<48x8xf32> to vector<6x8x8xf32>
    %30 = arith.truncf %13 : vector<6x8x8xf32> to vector<6x8x8xbf16>
    %31 = arith.truncf %21 : vector<6x8x8xf32> to vector<6x8x8xbf16>
    "tpu.trace_start"() <{level = 10 : i32, message = "nsd,ntd->nst"}> : () -> ()
    %cst_24 = arith.constant dense<0.000000e+00> : vector<6x8x8xf32>
    %32 = tpu.matmul %30, %31, %cst_24 {dimension_numbers = #tpu.dot_dimension_numbers<[2], [2], [1], [1], [0, 0, 0, 1, 1, 1], [0], [0]>} : vector<6x8x8xbf16>, vector<6x8x8xbf16>, vector<6x8x8xf32> -> vector<6x8x8xf32>
    "tpu.trace_stop"() : () -> ()
    %cst_25 = arith.constant 0.353553385 : f32
    %33 = vector.broadcast %cst_25 : f32 to vector<6x8x8xf32>
    %34 = arith.mulf %32, %33 : vector<6x8x8xf32>
    %cst_26 = arith.constant dense<0xFF800000> : vector<6x8xf32>
    %35 = vector.multi_reduction <maximumf>, %34, %cst_26 [2] : vector<6x8x8xf32> to vector<6x8xf32>
    %36 = vector.shape_cast %35 : vector<6x8xf32> to vector<6x8x1xf32>
    %37 = vector.broadcast %36 : vector<6x8x1xf32> to vector<6x8x8xf32>
    %38 = arith.subf %34, %37 : vector<6x8x8xf32>
    %39 = math.exp %38 : vector<6x8x8xf32>
    %cst_27 = arith.constant dense<0.000000e+00> : vector<6x8xf32>
    %40 = vector.multi_reduction <add>, %39, %cst_27 [2] : vector<6x8x8xf32> to vector<6x8xf32>
    %41 = vector.shape_cast %40 : vector<6x8xf32> to vector<6x8x1xf32>
    %42 = tpu.reciprocal %41 {approx = true} : vector<6x8x1xf32> -> vector<6x8x1xf32>
    %43 = vector.broadcast %42 : vector<6x8x1xf32> to vector<6x8x8xf32>
    %44 = arith.mulf %39, %43 : vector<6x8x8xf32>
    %45 = arith.truncf %44 : vector<6x8x8xf32> to vector<6x8x8xbf16>
    %46 = arith.truncf %29 : vector<6x8x8xf32> to vector<6x8x8xbf16>
    "tpu.trace_start"() <{level = 10 : i32, message = "nst,ntd->nsd"}> : () -> ()
    %cst_28 = arith.constant dense<0.000000e+00> : vector<6x8x8xf32>
    %47 = tpu.matmul %45, %46, %cst_28 {dimension_numbers = #tpu.dot_dimension_numbers<[2], [1], [1], [2], [0, 0, 0, 1, 1, 2], [0], [0]>} : vector<6x8x8xbf16>, vector<6x8x8xbf16>, vector<6x8x8xf32> -> vector<6x8x8xf32>
    "tpu.trace_stop"() : () -> ()
    %48 = vector.shape_cast %47 : vector<6x8x8xf32> to vector<48x8xf32>
    %49 = arith.truncf %48 : vector<48x8xf32> to vector<48x8xbf16>
    %c0_29 = arith.constant 0 : index
    %c0_30 = arith.constant 0 : index
    %c0_31 = arith.constant 0 : index
    %50 = vector.load %arg8[%c0_29, %c0_30, %c0_31] : memref<4x8x32xbf16, #tpu.memory_space<vmem>>, vector<1x8x32xbf16>
    %51 = vector.shape_cast %50 : vector<1x8x32xbf16> to vector<8x32xbf16>
    %cst_32 = arith.constant dense<0.000000e+00> : vector<48x32xf32>
    %52 = tpu.matmul %49, %51, %cst_32 {dimension_numbers = #tpu.dot_dimension_numbers<[1], [0], [0], [1], [0, 0, 1, 1], [], []>} : vector<48x8xbf16>, vector<8x32xbf16>, vector<48x32xf32> -> vector<48x32xf32>
    %53 = arith.addf %5, %52 : vector<48x32xf32>
    %c1 = arith.constant 1 : index
    %c0_33 = arith.constant 0 : index
    %c0_34 = arith.constant 0 : index
    %54 = vector.load %arg2[%c1, %c0_33, %c0_34] : memref<4x32x8xbf16, #tpu.memory_space<vmem>>, vector<1x32x8xbf16>
    %55 = vector.shape_cast %54 : vector<1x32x8xbf16> to vector<32x8xbf16>
    %cst_35 = arith.constant dense<0.000000e+00> : vector<48x8xf32>
    %56 = tpu.matmul %2, %55, %cst_35 {dimension_numbers = #tpu.dot_dimension_numbers<[1], [0], [0], [1], [0, 0, 1, 1], [], []>} : vector<48x32xbf16>, vector<32x8xbf16>, vector<48x8xf32> -> vector<48x8xf32>
    %c1_36 = arith.constant 1 : index
    %c0_37 = arith.constant 0 : index
    %c0_38 = arith.constant 0 : index
    %57 = vector.load %arg5[%c1_36, %c0_37, %c0_38] : memref<4x1x8xf32, #tpu.memory_space<vmem>>, vector<1x1x8xf32>
    %58 = vector.shape_cast %57 : vector<1x1x8xf32> to vector<1x8xf32>
    %59 = vector.broadcast %58 : vector<1x8xf32> to vector<48x8xf32>
    %60 = arith.addf %56, %59 : vector<48x8xf32>
    %61 = vector.shape_cast %60 : vector<48x8xf32> to vector<6x8x8xf32>
    %c1_39 = arith.constant 1 : index
    %c0_40 = arith.constant 0 : index
    %c0_41 = arith.constant 0 : index
    %62 = vector.load %arg3[%c1_39, %c0_40, %c0_41] : memref<4x32x8xbf16, #tpu.memory_space<vmem>>, vector<1x32x8xbf16>
    %63 = vector.shape_cast %62 : vector<1x32x8xbf16> to vector<32x8xbf16>
    %cst_42 = arith.constant dense<0.000000e+00> : vector<48x8xf32>
    %64 = tpu.matmul %2, %63, %cst_42 {dimension_numbers = #tpu.dot_dimension_numbers<[1], [0], [0], [1], [0, 0, 1, 1], [], []>} : vector<48x32xbf16>, vector<32x8xbf16>, vector<48x8xf32> -> vector<48x8xf32>
    %c1_43 = arith.constant 1 : index
    %c0_44 = arith.constant 0 : index
    %c0_45 = arith.constant 0 : index
    %65 = vector.load %arg6[%c1_43, %c0_44, %c0_45] : memref<4x1x8xf32, #tpu.memory_space<vmem>>, vector<1x1x8xf32>
    %66 = vector.shape_cast %65 : vector<1x1x8xf32> to vector<1x8xf32>
    %67 = vector.broadcast %66 : vector<1x8xf32> to vector<48x8xf32>
    %68 = arith.addf %64, %67 : vector<48x8xf32>
    %69 = vector.shape_cast %68 : vector<48x8xf32> to vector<6x8x8xf32>
    %c1_46 = arith.constant 1 : index
    %c0_47 = arith.constant 0 : index
    %c0_48 = arith.constant 0 : index
    %70 = vector.load %arg4[%c1_46, %c0_47, %c0_48] : memref<4x32x8xbf16, #tpu.memory_space<vmem>>, vector<1x32x8xbf16>
    %71 = vector.shape_cast %70 : vector<1x32x8xbf16> to vector<32x8xbf16>
    %cst_49 = arith.constant dense<0.000000e+00> : vector<48x8xf32>
    %72 = tpu.matmul %2, %71, %cst_49 {dimension_numbers = #tpu.dot_dimension_numbers<[1], [0], [0], [1], [0, 0, 1, 1], [], []>} : vector<48x32xbf16>, vector<32x8xbf16>, vector<48x8xf32> -> vector<48x8xf32>
    %c1_50 = arith.constant 1 : index
    %c0_51 = arith.constant 0 : index
    %c0_52 = arith.constant 0 : index
    %73 = vector.load %arg7[%c1_50, %c0_51, %c0_52] : memref<4x1x8xf32, #tpu.memory_space<vmem>>, vector<1x1x8xf32>
    %74 = vector.shape_cast %73 : vector<1x1x8xf32> to vector<1x8xf32>
    %75 = vector.broadcast %74 : vector<1x8xf32> to vector<48x8xf32>
    %76 = arith.addf %72, %75 : vector<48x8xf32>
    %77 = vector.shape_cast %76 : vector<48x8xf32> to vector<6x8x8xf32>
    %78 = arith.truncf %61 : vector<6x8x8xf32> to vector<6x8x8xbf16>
    %79 = arith.truncf %69 : vector<6x8x8xf32> to vector<6x8x8xbf16>
    "tpu.trace_start"() <{level = 10 : i32, message = "nsd,ntd->nst"}> : () -> ()
    %cst_53 = arith.constant dense<0.000000e+00> : vector<6x8x8xf32>
    %80 = tpu.matmul %78, %79, %cst_53 {dimension_numbers = #tpu.dot_dimension_numbers<[2], [2], [1], [1], [0, 0, 0, 1, 1, 1], [0], [0]>} : vector<6x8x8xbf16>, vector<6x8x8xbf16>, vector<6x8x8xf32> -> vector<6x8x8xf32>
    "tpu.trace_stop"() : () -> ()
    %cst_54 = arith.constant 0.353553385 : f32
    %81 = vector.broadcast %cst_54 : f32 to vector<6x8x8xf32>
    %82 = arith.mulf %80, %81 : vector<6x8x8xf32>
    %cst_55 = arith.constant dense<0xFF800000> : vector<6x8xf32>
    %83 = vector.multi_reduction <maximumf>, %82, %cst_55 [2] : vector<6x8x8xf32> to vector<6x8xf32>
    %84 = vector.shape_cast %83 : vector<6x8xf32> to vector<6x8x1xf32>
    %85 = vector.broadcast %84 : vector<6x8x1xf32> to vector<6x8x8xf32>
    %86 = arith.subf %82, %85 : vector<6x8x8xf32>
    %87 = math.exp %86 : vector<6x8x8xf32>
    %cst_56 = arith.constant dense<0.000000e+00> : vector<6x8xf32>
    %88 = vector.multi_reduction <add>, %87, %cst_56 [2] : vector<6x8x8xf32> to vector<6x8xf32>
    %89 = vector.shape_cast %88 : vector<6x8xf32> to vector<6x8x1xf32>
    %90 = tpu.reciprocal %89 {approx = true} : vector<6x8x1xf32> -> vector<6x8x1xf32>
    %91 = vector.broadcast %90 : vector<6x8x1xf32> to vector<6x8x8xf32>
    %92 = arith.mulf %87, %91 : vector<6x8x8xf32>
    %93 = arith.truncf %92 : vector<6x8x8xf32> to vector<6x8x8xbf16>
    %94 = arith.truncf %77 : vector<6x8x8xf32> to vector<6x8x8xbf16>
    "tpu.trace_start"() <{level = 10 : i32, message = "nst,ntd->nsd"}> : () -> ()
    %cst_57 = arith.constant dense<0.000000e+00> : vector<6x8x8xf32>
    %95 = tpu.matmul %93, %94, %cst_57 {dimension_numbers = #tpu.dot_dimension_numbers<[2], [1], [1], [2], [0, 0, 0, 1, 1, 2], [0], [0]>} : vector<6x8x8xbf16>, vector<6x8x8xbf16>, vector<6x8x8xf32> -> vector<6x8x8xf32>
    "tpu.trace_stop"() : () -> ()
    %96 = vector.shape_cast %95 : vector<6x8x8xf32> to vector<48x8xf32>
    %97 = arith.truncf %96 : vector<48x8xf32> to vector<48x8xbf16>
    %c1_58 = arith.constant 1 : index
    %c0_59 = arith.constant 0 : index
    %c0_60 = arith.constant 0 : index
    %98 = vector.load %arg8[%c1_58, %c0_59, %c0_60] : memref<4x8x32xbf16, #tpu.memory_space<vmem>>, vector<1x8x32xbf16>
    %99 = vector.shape_cast %98 : vector<1x8x32xbf16> to vector<8x32xbf16>
    %cst_61 = arith.constant dense<0.000000e+00> : vector<48x32xf32>
    %100 = tpu.matmul %97, %99, %cst_61 {dimension_numbers = #tpu.dot_dimension_numbers<[1], [0], [0], [1], [0, 0, 1, 1], [], []>} : vector<48x8xbf16>, vector<8x32xbf16>, vector<48x32xf32> -> vector<48x32xf32>
    %101 = arith.addf %53, %100 : vector<48x32xf32>
    %c2 = arith.constant 2 : index
    %c0_62 = arith.constant 0 : index
    %c0_63 = arith.constant 0 : index
    %102 = vector.load %arg2[%c2, %c0_62, %c0_63] : memref<4x32x8xbf16, #tpu.memory_space<vmem>>, vector<1x32x8xbf16>
    %103 = vector.shape_cast %102 : vector<1x32x8xbf16> to vector<32x8xbf16>
    %cst_64 = arith.constant dense<0.000000e+00> : vector<48x8xf32>
    %104 = tpu.matmul %2, %103, %cst_64 {dimension_numbers = #tpu.dot_dimension_numbers<[1], [0], [0], [1], [0, 0, 1, 1], [], []>} : vector<48x32xbf16>, vector<32x8xbf16>, vector<48x8xf32> -> vector<48x8xf32>
    %c2_65 = arith.constant 2 : index
    %c0_66 = arith.constant 0 : index
    %c0_67 = arith.constant 0 : index
    %105 = vector.load %arg5[%c2_65, %c0_66, %c0_67] : memref<4x1x8xf32, #tpu.memory_space<vmem>>, vector<1x1x8xf32>
    %106 = vector.shape_cast %105 : vector<1x1x8xf32> to vector<1x8xf32>
    %107 = vector.broadcast %106 : vector<1x8xf32> to vector<48x8xf32>
    %108 = arith.addf %104, %107 : vector<48x8xf32>
    %109 = vector.shape_cast %108 : vector<48x8xf32> to vector<6x8x8xf32>
    %c2_68 = arith.constant 2 : index
    %c0_69 = arith.constant 0 : index
    %c0_70 = arith.constant 0 : index
    %110 = vector.load %arg3[%c2_68, %c0_69, %c0_70] : memref<4x32x8xbf16, #tpu.memory_space<vmem>>, vector<1x32x8xbf16>
    %111 = vector.shape_cast %110 : vector<1x32x8xbf16> to vector<32x8xbf16>
    %cst_71 = arith.constant dense<0.000000e+00> : vector<48x8xf32>
    %112 = tpu.matmul %2, %111, %cst_71 {dimension_numbers = #tpu.dot_dimension_numbers<[1], [0], [0], [1], [0, 0, 1, 1], [], []>} : vector<48x32xbf16>, vector<32x8xbf16>, vector<48x8xf32> -> vector<48x8xf32>
    %c2_72 = arith.constant 2 : index
    %c0_73 = arith.constant 0 : index
    %c0_74 = arith.constant 0 : index
    %113 = vector.load %arg6[%c2_72, %c0_73, %c0_74] : memref<4x1x8xf32, #tpu.memory_space<vmem>>, vector<1x1x8xf32>
    %114 = vector.shape_cast %113 : vector<1x1x8xf32> to vector<1x8xf32>
    %115 = vector.broadcast %114 : vector<1x8xf32> to vector<48x8xf32>
    %116 = arith.addf %112, %115 : vector<48x8xf32>
    %117 = vector.shape_cast %116 : vector<48x8xf32> to vector<6x8x8xf32>
    %c2_75 = arith.constant 2 : index
    %c0_76 = arith.constant 0 : index
    %c0_77 = arith.constant 0 : index
    %118 = vector.load %arg4[%c2_75, %c0_76, %c0_77] : memref<4x32x8xbf16, #tpu.memory_space<vmem>>, vector<1x32x8xbf16>
    %119 = vector.shape_cast %118 : vector<1x32x8xbf16> to vector<32x8xbf16>
    %cst_78 = arith.constant dense<0.000000e+00> : vector<48x8xf32>
    %120 = tpu.matmul %2, %119, %cst_78 {dimension_numbers = #tpu.dot_dimension_numbers<[1], [0], [0], [1], [0, 0, 1, 1], [], []>} : vector<48x32xbf16>, vector<32x8xbf16>, vector<48x8xf32> -> vector<48x8xf32>
    %c2_79 = arith.constant 2 : index
    %c0_80 = arith.constant 0 : index
    %c0_81 = arith.constant 0 : index
    %121 = vector.load %arg7[%c2_79, %c0_80, %c0_81] : memref<4x1x8xf32, #tpu.memory_space<vmem>>, vector<1x1x8xf32>
    %122 = vector.shape_cast %121 : vector<1x1x8xf32> to vector<1x8xf32>
    %123 = vector.broadcast %122 : vector<1x8xf32> to vector<48x8xf32>
    %124 = arith.addf %120, %123 : vector<48x8xf32>
    %125 = vector.shape_cast %124 : vector<48x8xf32> to vector<6x8x8xf32>
    %126 = arith.truncf %109 : vector<6x8x8xf32> to vector<6x8x8xbf16>
    %127 = arith.truncf %117 : vector<6x8x8xf32> to vector<6x8x8xbf16>
    "tpu.trace_start"() <{level = 10 : i32, message = "nsd,ntd->nst"}> : () -> ()
    %cst_82 = arith.constant dense<0.000000e+00> : vector<6x8x8xf32>
    %128 = tpu.matmul %126, %127, %cst_82 {dimension_numbers = #tpu.dot_dimension_numbers<[2], [2], [1], [1], [0, 0, 0, 1, 1, 1], [0], [0]>} : vector<6x8x8xbf16>, vector<6x8x8xbf16>, vector<6x8x8xf32> -> vector<6x8x8xf32>
    "tpu.trace_stop"() : () -> ()
    %cst_83 = arith.constant 0.353553385 : f32
    %129 = vector.broadcast %cst_83 : f32 to vector<6x8x8xf32>
    %130 = arith.mulf %128, %129 : vector<6x8x8xf32>
    %cst_84 = arith.constant dense<0xFF800000> : vector<6x8xf32>
    %131 = vector.multi_reduction <maximumf>, %130, %cst_84 [2] : vector<6x8x8xf32> to vector<6x8xf32>
    %132 = vector.shape_cast %131 : vector<6x8xf32> to vector<6x8x1xf32>
    %133 = vector.broadcast %132 : vector<6x8x1xf32> to vector<6x8x8xf32>
    %134 = arith.subf %130, %133 : vector<6x8x8xf32>
    %135 = math.exp %134 : vector<6x8x8xf32>
    %cst_85 = arith.constant dense<0.000000e+00> : vector<6x8xf32>
    %136 = vector.multi_reduction <add>, %135, %cst_85 [2] : vector<6x8x8xf32> to vector<6x8xf32>
    %137 = vector.shape_cast %136 : vector<6x8xf32> to vector<6x8x1xf32>
    %138 = tpu.reciprocal %137 {approx = true} : vector<6x8x1xf32> -> vector<6x8x1xf32>
    %139 = vector.broadcast %138 : vector<6x8x1xf32> to vector<6x8x8xf32>
    %140 = arith.mulf %135, %139 : vector<6x8x8xf32>
    %141 = arith.truncf %140 : vector<6x8x8xf32> to vector<6x8x8xbf16>
    %142 = arith.truncf %125 : vector<6x8x8xf32> to vector<6x8x8xbf16>
    "tpu.trace_start"() <{level = 10 : i32, message = "nst,ntd->nsd"}> : () -> ()
    %cst_86 = arith.constant dense<0.000000e+00> : vector<6x8x8xf32>
    %143 = tpu.matmul %141, %142, %cst_86 {dimension_numbers = #tpu.dot_dimension_numbers<[2], [1], [1], [2], [0, 0, 0, 1, 1, 2], [0], [0]>} : vector<6x8x8xbf16>, vector<6x8x8xbf16>, vector<6x8x8xf32> -> vector<6x8x8xf32>
    "tpu.trace_stop"() : () -> ()
    %144 = vector.shape_cast %143 : vector<6x8x8xf32> to vector<48x8xf32>
    %145 = arith.truncf %144 : vector<48x8xf32> to vector<48x8xbf16>
    %c2_87 = arith.constant 2 : index
    %c0_88 = arith.constant 0 : index
    %c0_89 = arith.constant 0 : index
    %146 = vector.load %arg8[%c2_87, %c0_88, %c0_89] : memref<4x8x32xbf16, #tpu.memory_space<vmem>>, vector<1x8x32xbf16>
    %147 = vector.shape_cast %146 : vector<1x8x32xbf16> to vector<8x32xbf16>
    %cst_90 = arith.constant dense<0.000000e+00> : vector<48x32xf32>
    %148 = tpu.matmul %145, %147, %cst_90 {dimension_numbers = #tpu.dot_dimension_numbers<[1], [0], [0], [1], [0, 0, 1, 1], [], []>} : vector<48x8xbf16>, vector<8x32xbf16>, vector<48x32xf32> -> vector<48x32xf32>
    %149 = arith.addf %101, %148 : vector<48x32xf32>
    %c3 = arith.constant 3 : index
    %c0_91 = arith.constant 0 : index
    %c0_92 = arith.constant 0 : index
    %150 = vector.load %arg2[%c3, %c0_91, %c0_92] : memref<4x32x8xbf16, #tpu.memory_space<vmem>>, vector<1x32x8xbf16>
    %151 = vector.shape_cast %150 : vector<1x32x8xbf16> to vector<32x8xbf16>
    %cst_93 = arith.constant dense<0.000000e+00> : vector<48x8xf32>
    %152 = tpu.matmul %2, %151, %cst_93 {dimension_numbers = #tpu.dot_dimension_numbers<[1], [0], [0], [1], [0, 0, 1, 1], [], []>} : vector<48x32xbf16>, vector<32x8xbf16>, vector<48x8xf32> -> vector<48x8xf32>
    %c3_94 = arith.constant 3 : index
    %c0_95 = arith.constant 0 : index
    %c0_96 = arith.constant 0 : index
    %153 = vector.load %arg5[%c3_94, %c0_95, %c0_96] : memref<4x1x8xf32, #tpu.memory_space<vmem>>, vector<1x1x8xf32>
    %154 = vector.shape_cast %153 : vector<1x1x8xf32> to vector<1x8xf32>
    %155 = vector.broadcast %154 : vector<1x8xf32> to vector<48x8xf32>
    %156 = arith.addf %152, %155 : vector<48x8xf32>
    %157 = vector.shape_cast %156 : vector<48x8xf32> to vector<6x8x8xf32>
    %c3_97 = arith.constant 3 : index
    %c0_98 = arith.constant 0 : index
    %c0_99 = arith.constant 0 : index
    %158 = vector.load %arg3[%c3_97, %c0_98, %c0_99] : memref<4x32x8xbf16, #tpu.memory_space<vmem>>, vector<1x32x8xbf16>
    %159 = vector.shape_cast %158 : vector<1x32x8xbf16> to vector<32x8xbf16>
    %cst_100 = arith.constant dense<0.000000e+00> : vector<48x8xf32>
    %160 = tpu.matmul %2, %159, %cst_100 {dimension_numbers = #tpu.dot_dimension_numbers<[1], [0], [0], [1], [0, 0, 1, 1], [], []>} : vector<48x32xbf16>, vector<32x8xbf16>, vector<48x8xf32> -> vector<48x8xf32>
    %c3_101 = arith.constant 3 : index
    %c0_102 = arith.constant 0 : index
    %c0_103 = arith.constant 0 : index
    %161 = vector.load %arg6[%c3_101, %c0_102, %c0_103] : memref<4x1x8xf32, #tpu.memory_space<vmem>>, vector<1x1x8xf32>
    %162 = vector.shape_cast %161 : vector<1x1x8xf32> to vector<1x8xf32>
    %163 = vector.broadcast %162 : vector<1x8xf32> to vector<48x8xf32>
    %164 = arith.addf %160, %163 : vector<48x8xf32>
    %165 = vector.shape_cast %164 : vector<48x8xf32> to vector<6x8x8xf32>
    %c3_104 = arith.constant 3 : index
    %c0_105 = arith.constant 0 : index
    %c0_106 = arith.constant 0 : index
    %166 = vector.load %arg4[%c3_104, %c0_105, %c0_106] : memref<4x32x8xbf16, #tpu.memory_space<vmem>>, vector<1x32x8xbf16>
    %167 = vector.shape_cast %166 : vector<1x32x8xbf16> to vector<32x8xbf16>
    %cst_107 = arith.constant dense<0.000000e+00> : vector<48x8xf32>
    %168 = tpu.matmul %2, %167, %cst_107 {dimension_numbers = #tpu.dot_dimension_numbers<[1], [0], [0], [1], [0, 0, 1, 1], [], []>} : vector<48x32xbf16>, vector<32x8xbf16>, vector<48x8xf32> -> vector<48x8xf32>
    %c3_108 = arith.constant 3 : index
    %c0_109 = arith.constant 0 : index
    %c0_110 = arith.constant 0 : index
    %169 = vector.load %arg7[%c3_108, %c0_109, %c0_110] : memref<4x1x8xf32, #tpu.memory_space<vmem>>, vector<1x1x8xf32>
    %170 = vector.shape_cast %169 : vector<1x1x8xf32> to vector<1x8xf32>
    %171 = vector.broadcast %170 : vector<1x8xf32> to vector<48x8xf32>
    %172 = arith.addf %168, %171 : vector<48x8xf32>
    %173 = vector.shape_cast %172 : vector<48x8xf32> to vector<6x8x8xf32>
    %174 = arith.truncf %157 : vector<6x8x8xf32> to vector<6x8x8xbf16>
    %175 = arith.truncf %165 : vector<6x8x8xf32> to vector<6x8x8xbf16>
    "tpu.trace_start"() <{level = 10 : i32, message = "nsd,ntd->nst"}> : () -> ()
    %cst_111 = arith.constant dense<0.000000e+00> : vector<6x8x8xf32>
    %176 = tpu.matmul %174, %175, %cst_111 {dimension_numbers = #tpu.dot_dimension_numbers<[2], [2], [1], [1], [0, 0, 0, 1, 1, 1], [0], [0]>} : vector<6x8x8xbf16>, vector<6x8x8xbf16>, vector<6x8x8xf32> -> vector<6x8x8xf32>
    "tpu.trace_stop"() : () -> ()
    %cst_112 = arith.constant 0.353553385 : f32
    %177 = vector.broadcast %cst_112 : f32 to vector<6x8x8xf32>
    %178 = arith.mulf %176, %177 : vector<6x8x8xf32>
    %cst_113 = arith.constant dense<0xFF800000> : vector<6x8xf32>
    %179 = vector.multi_reduction <maximumf>, %178, %cst_113 [2] : vector<6x8x8xf32> to vector<6x8xf32>
    %180 = vector.shape_cast %179 : vector<6x8xf32> to vector<6x8x1xf32>
    %181 = vector.broadcast %180 : vector<6x8x1xf32> to vector<6x8x8xf32>
    %182 = arith.subf %178, %181 : vector<6x8x8xf32>
    %183 = math.exp %182 : vector<6x8x8xf32>
    %cst_114 = arith.constant dense<0.000000e+00> : vector<6x8xf32>
    %184 = vector.multi_reduction <add>, %183, %cst_114 [2] : vector<6x8x8xf32> to vector<6x8xf32>
    %185 = vector.shape_cast %184 : vector<6x8xf32> to vector<6x8x1xf32>
    %186 = tpu.reciprocal %185 {approx = true} : vector<6x8x1xf32> -> vector<6x8x1xf32>
    %187 = vector.broadcast %186 : vector<6x8x1xf32> to vector<6x8x8xf32>
    %188 = arith.mulf %183, %187 : vector<6x8x8xf32>
    %189 = arith.truncf %188 : vector<6x8x8xf32> to vector<6x8x8xbf16>
    %190 = arith.truncf %173 : vector<6x8x8xf32> to vector<6x8x8xbf16>
    "tpu.trace_start"() <{level = 10 : i32, message = "nst,ntd->nsd"}> : () -> ()
    %cst_115 = arith.constant dense<0.000000e+00> : vector<6x8x8xf32>
    %191 = tpu.matmul %189, %190, %cst_115 {dimension_numbers = #tpu.dot_dimension_numbers<[2], [1], [1], [2], [0, 0, 0, 1, 1, 2], [0], [0]>} : vector<6x8x8xbf16>, vector<6x8x8xbf16>, vector<6x8x8xf32> -> vector<6x8x8xf32>
    "tpu.trace_stop"() : () -> ()
    %192 = vector.shape_cast %191 : vector<6x8x8xf32> to vector<48x8xf32>
    %193 = arith.truncf %192 : vector<48x8xf32> to vector<48x8xbf16>
    %c3_116 = arith.constant 3 : index
    %c0_117 = arith.constant 0 : index
    %c0_118 = arith.constant 0 : index
    %194 = vector.load %arg8[%c3_116, %c0_117, %c0_118] : memref<4x8x32xbf16, #tpu.memory_space<vmem>>, vector<1x8x32xbf16>
    %195 = vector.shape_cast %194 : vector<1x8x32xbf16> to vector<8x32xbf16>
    %cst_119 = arith.constant dense<0.000000e+00> : vector<48x32xf32>
    %196 = tpu.matmul %193, %195, %cst_119 {dimension_numbers = #tpu.dot_dimension_numbers<[1], [0], [0], [1], [0, 0, 1, 1], [], []>} : vector<48x8xbf16>, vector<8x32xbf16>, vector<48x32xf32> -> vector<48x32xf32>
    %197 = arith.addf %149, %196 : vector<48x32xf32>
    %cst_120 = arith.constant dense<0.000000e+00> : vector<48xf32>
    %198 = vector.multi_reduction <add>, %197, %cst_120 [1] : vector<48x32xf32> to vector<48xf32>
    %199 = vector.shape_cast %198 : vector<48xf32> to vector<48x1xf32>
    %cst_121 = arith.constant 3.200000e+01 : f32
    %200 = vector.broadcast %cst_121 : f32 to vector<48x1xf32>
    %201 = arith.divf %199, %200 : vector<48x1xf32>
    %202 = vector.broadcast %201 : vector<48x1xf32> to vector<48x32xf32>
    %203 = arith.subf %197, %202 : vector<48x32xf32>
    %204 = arith.mulf %203, %203 : vector<48x32xf32>
    %cst_122 = arith.constant dense<0.000000e+00> : vector<48xf32>
    %205 = vector.multi_reduction <add>, %204, %cst_122 [1] : vector<48x32xf32> to vector<48xf32>
    %206 = vector.shape_cast %205 : vector<48xf32> to vector<48x1xf32>
    %cst_123 = arith.constant 3.200000e+01 : f32
    %207 = vector.broadcast %cst_123 : f32 to vector<48x1xf32>
    %208 = arith.divf %206, %207 : vector<48x1xf32>
    %cst_124 = arith.constant 9.99999974E-6 : f32
    %209 = vector.broadcast %cst_124 : f32 to vector<48x1xf32>
    %210 = arith.addf %208, %209 : vector<48x1xf32>
    %211 = math.rsqrt %210 : vector<48x1xf32>
    %212 = vector.broadcast %211 : vector<48x1xf32> to vector<48x32xf32>
    %213 = arith.mulf %203, %212 : vector<48x32xf32>
    %c0_125 = arith.constant 0 : index
    %c0_126 = arith.constant 0 : index
    %214 = vector.load %arg10[%c0_125, %c0_126] : memref<1x32xf32, #tpu.memory_space<vmem>>, vector<1x32xf32>
    %215 = vector.broadcast %214 : vector<1x32xf32> to vector<48x32xf32>
    %216 = arith.mulf %213, %215 : vector<48x32xf32>
    %c0_127 = arith.constant 0 : index
    %c0_128 = arith.constant 0 : index
    %217 = vector.load %arg11[%c0_127, %c0_128] : memref<1x32xf32, #tpu.memory_space<vmem>>, vector<1x32xf32>
    %218 = vector.broadcast %217 : vector<1x32xf32> to vector<48x32xf32>
    %219 = arith.addf %216, %218 : vector<48x32xf32>
    %220 = vector.shape_cast %219 : vector<48x32xf32> to vector<6x8x32xf32>
    %c0_129 = arith.constant 0 : index
    %c0_130 = arith.constant 0 : index
    %c0_131 = arith.constant 0 : index
    %221 = vector.load %arg12[%c0_129, %c0_130, %c0_131] : memref<6x8x32xf32, #tpu.memory_space<vmem>>, vector<6x8x32xf32>
    tpu.vector_store %arg12[%c0_129, %c0_130, %c0_131], %220 {strides = array<i32>} : memref<6x8x32xf32, #tpu.memory_space<vmem>>, vector<6x8x32xf32>,
    return
  }
  func.func @transform_0(%arg0: i32) -> (i32, i32, i32) {
    %c0_i32 = arith.constant 0 : i32
    %c0_i32_0 = arith.constant 0 : i32
    %c0_i32_1 = arith.constant 0 : i32
    return %arg0, %c0_i32, %c0_i32_0 : i32, i32, i32
  }
  func.func @transform_1(%arg0: i32) -> (i32, i32, i32) {
    %c0_i32 = arith.constant 0 : i32
    %c0_i32_0 = arith.constant 0 : i32
    %c0_i32_1 = arith.constant 0 : i32
    %c0_i32_2 = arith.constant 0 : i32
    return %c0_i32, %c0_i32_0, %c0_i32_1 : i32, i32, i32
  }
  func.func @transform_2(%arg0: i32) -> (i32, i32, i32) {
    %c0_i32 = arith.constant 0 : i32
    %c0_i32_0 = arith.constant 0 : i32
    %c0_i32_1 = arith.constant 0 : i32
    %c0_i32_2 = arith.constant 0 : i32
    return %c0_i32, %c0_i32_0, %c0_i32_1 : i32, i32, i32
  }
  func.func @transform_3(%arg0: i32) -> (i32, i32, i32) {
    %c0_i32 = arith.constant 0 : i32
    %c0_i32_0 = arith.constant 0 : i32
    %c0_i32_1 = arith.constant 0 : i32
    %c0_i32_2 = arith.constant 0 : i32
    return %c0_i32, %c0_i32_0, %c0_i32_1 : i32, i32, i32
  }
  func.func @transform_4(%arg0: i32) -> (i32, i32, i32) {
    %c0_i32 = arith.constant 0 : i32
    %c0_i32_0 = arith.constant 0 : i32
    %c0_i32_1 = arith.constant 0 : i32
    %c0_i32_2 = arith.constant 0 : i32
    return %c0_i32, %c0_i32_0, %c0_i32_1 : i32, i32, i32
  }
  func.func @transform_5(%arg0: i32) -> (i32, i32, i32) {
    %c0_i32 = arith.constant 0 : i32
    %c0_i32_0 = arith.constant 0 : i32
    %c0_i32_1 = arith.constant 0 : i32
    %c0_i32_2 = arith.constant 0 : i32
    return %c0_i32, %c0_i32_0, %c0_i32_1 : i32, i32, i32
  }
  func.func @transform_6(%arg0: i32) -> (i32, i32, i32) {
    %c0_i32 = arith.constant 0 : i32
    %c0_i32_0 = arith.constant 0 : i32
    %c0_i32_1 = arith.constant 0 : i32
    %c0_i32_2 = arith.constant 0 : i32
    return %c0_i32, %c0_i32_0, %c0_i32_1 : i32, i32, i32
  }
  func.func @transform_7(%arg0: i32) -> (i32, i32, i32) {
    %c0_i32 = arith.constant 0 : i32
    %c0_i32_0 = arith.constant 0 : i32
    %c0_i32_1 = arith.constant 0 : i32
    %c0_i32_2 = arith.constant 0 : i32
    return %c0_i32, %c0_i32_0, %c0_i32_1 : i32, i32, i32
  }
  func.func @transform_8(%arg0: i32) -> (i32, i32) {
    %c0_i32 = arith.constant 0 : i32
    %c0_i32_0 = arith.constant 0 : i32
    %c0_i32_1 = arith.constant 0 : i32
    return %c0_i32, %c0_i32_0 : i32, i32
  }
  func.func @transform_9(%arg0: i32) -> (i32, i32) {
    %c0_i32 = arith.constant 0 : i32
    %c0_i32_0 = arith.constant 0 : i32
    %c0_i32_1 = arith.constant 0 : i32
    return %c0_i32, %c0_i32_0 : i32, i32
  }
  func.func @transform_10(%arg0: i32) -> (i32, i32) {
    %c0_i32 = arith.constant 0 : i32
    %c0_i32_0 = arith.constant 0 : i32
    %c0_i32_1 = arith.constant 0 : i32
    return %c0_i32, %c0_i32_0 : i32, i32
  }
  func.func @transform_11(%arg0: i32) -> (i32, i32, i32) {
    %c0_i32 = arith.constant 0 : i32
    %c0_i32_0 = arith.constant 0 : i32
    %c0_i32_1 = arith.constant 0 : i32
    return %arg0, %c0_i32, %c0_i32_0 : i32, i32, i32
  }
}

</mosaic_0001>

<bundles_post_ra>
// kernel: tpu_custom_call.1
= control target key start
LH: loop header
LB: loop body
LE: loop exit
PB: predicated region body
PF: predicated region fallthrough
CT: control target
= control target key end

     0   :  { %v5194_v1 = vmov 0.0   ;;  %vm5195_vm0 = vmmov 0   ;;  %vm85_vm1 = vcmask 261120   ;;  %s6114_s0 = inlined_call_operand.vmem [shape: f32[6,8,32], index: 0, kind: input, shape index: {}]   ;;  %s6115_s1 = inlined_call_operand.vmem [shape: bf16[4,32,8], index: 1, kind: input, shape index: {}]   ;;  %s6116_s2 = inlined_call_operand.vmem [shape: bf16[4,32,8], index: 2, kind: input, shape index: {}]   ;;  %s6117_s3 = inlined_call_operand.vmem [shape: bf16[4,32,8], index: 3, kind: input, shape index: {}]   ;;  %s6118_s4 = inlined_call_operand.vmem [shape: f32[4,1,8], index: 4, kind: input, shape index: {}]   ;;  %s6119_s5 = inlined_call_operand.vmem [shape: f32[4,1,8], index: 5, kind: input, shape index: {}]   ;;  %s6120_s6 = inlined_call_operand.vmem [shape: f32[4,1,8], index: 6, kind: input, shape index: {}]   ;;  %s6121_s7 = inlined_call_operand.vmem [shape: bf16[4,8,32], index: 7, kind: input, shape index: {}]   ;;  %s6122_s8 = inlined_call_operand.vmem [shape: f32[1,32], index: 8, kind: input, shape index: {}]   ;;  %s6123_s9 = inlined_call_operand.vmem [shape: f32[1,32], index: 9, kind: input, shape index: {}]   ;;  %s6124_s10 = inlined_call_operand.vmem [shape: f32[1,32], index: 10, kind: input, shape index: {}]   ;;  %s6125_s11 = inlined_call_operand.hbm [shape: f32[6,8,32], index: 11, kind: output, shape index: {}]  }
   0x1   :  { %v5032_v0 = vld [vmem:[%s6115_s1] sm:$0xff]   ;;  %4445 = vmatprep.subr.bf16.mxu0 %v5194_v1  ;;  %4981 = vmatprep.subr.bf16.mxu1 %v5194_v1  ;;  %v5034_v3 = vld [vmem:[%s6115_s1 + $0x8] sm:$0xff]   ;;  %v42_v7 = vld [vmem:[%s6114_s0 + $0x10] sm:$0xff] }
   0x2   :  { %v5033_v2 = vld [vmem:[%s6116_s2] sm:$0xff]   ;;  %4446 = vmatpush3.bf16.msra.mxu0 %v5032_v0  ;;  %4449 = vmatprep.mubr.msk.bf16.mxu0 %vm5195_vm0, %v5194_v1  ;;  %v5035_v4 = vld [vmem:[%s6116_s2 + $0x8] sm:$0xff]   ;;  %v43_v9 = vld [vmem:[%s6114_s0 + $0x18] sm:$0xff] }
   0x3   :  { %4983 = vmatpush3.bf16.msra.mxu1 %v5033_v2  ;;  %4447 = vmatprep.subr.bf16.mxu0 %v5194_v1  ;;  %v40_v5 = vld [vmem:[%s6114_s0] sm:$0xff]  ;;  %v41_v6 = vld [vmem:[%s6114_s0 + $0x8] sm:$0xff]  ;;  %v5293_v10 = vpack.c.bf16 %v43_v9, %v42_v7 }
   0x4   :  { %4982 = vmatprep.subr.bf16.mxu1 %v5194_v1  ;;  %4469 = vmatprep.mubr.msk.bf16.mxu1 %vm5195_vm0, %v5194_v1  ;;  %v5288_v8 = vpack.c.bf16 %v41_v6, %v40_v5  ;;  %v44_v11 = vld [vmem:[%s6114_s0 + $0x20] sm:$0xff]  ;;  %v45_v12 = vld [vmem:[%s6114_s0 + $0x28] sm:$0xff] }
   0x5   :  { %v5312_v13 = vpack.c.bf16 %v45_v12, %v44_v11 }
   0x6   :  { %4448 = vmatpush3.bf16.msra.mxu0 %v5034_v3 }
   0x7   :  { %4984 = vmatpush3.bf16.msra.mxu1 %v5035_v4  ;;  %4461 = vmatprep.subr.bf16.mxu0 %v5194_v1 }
   0x8   :  { %4493 = vmatprep.subr.bf16.mxu1 %v5194_v1 }
   0x9   :  { %4450 = vmatmul.mubr.msk.bf16.vlgmr.msra.gmra.mrb[0].mxu0 %vm85_vm1, %v5288_v8 }
   0xa   :  { %4470 = vmatmul.mubr.msk.bf16.vlgmr.msra.gmra.mrb[0].mxu1 %vm85_vm1, %v5293_v10  ;;  %4453 = vmatprep.mubr.msk.bf16.mxu0 %vm5195_vm0, %v5194_v1 }
   0xb   :  { %4473 = vmatprep.mubr.msk.bf16.mxu1 %vm5195_vm0, %v5194_v1  ;;  %4462 = vmatpush3.bf16.msra.mxu0 %v5033_v2 }
   0xc   :  { %4463 = vmatprep.subr.bf16.mxu0 %v5194_v1 }
   0xf   :  { %4464 = vmatpush3.bf16.msra.mxu0 %v5035_v4 }
  0x10   :  { %4477 = vmatprep.subr.bf16.mxu0 %v5194_v1 }
  0x11   :  { %4454 = vmatmul.mubr.msk.bf16.gmra.mrb[4].mxu0 %vm85_vm1, %v5293_v10 }
  0x12   :  { %4474 = vmatmul.mubr.msk.bf16.gmra.mrb[4].mxu1 %vm85_vm1, %v5312_v13  ;;  %4457 = vmatprep.mubr.msk.bf16.mxu0 %vm5195_vm0, %v5194_v1 }
  0x13   :  { %4495 = vmatprep.mubr.msk.bf16.mxu1 %vm5195_vm0, %v5194_v1 }
  0x14   :  { %16 = vsyncpa [#allocation3], 0  ;;  %v5036_v14 = vld [vmem:[%s6117_s3] sm:$0xff]   ;;  %v5037_v15 = vld [vmem:[%s6117_s3 + $0x8] sm:$0xff]   ;;  %vm324_vm2 = vcmask 64512   ;;  %vm688_vm3 = vcmask 1043456  }
  0x15   :  { %v5354_v17 = vld [vmem:[%s6119_s5] ss:$0 sm:$0xff] }
  0x16   :  { %v5367_v31 = vld [vmem:[%s6118_s4] ss:$0 sm:$0xff] }
  0x17   :  { %v4103_v57 = vld [vmem:[%s6120_s6] ss:$0 sm:$0xff] }
  0x19   :  { %4458 = vmatmul.mubr.msk.bf16.gmra.mrb[8].mxu0 %vm85_vm1, %v5312_v13 }
  0x1a   :  { %4465 = vmatprep.mubr.msk.bf16.mxu0 %vm5195_vm0, %v5194_v1 }
  0x21   :  { %4466 = vmatmul.mubr.msk.bf16.vlgmr.msra.gmra.mrb[12].mxu0 %vm85_vm1, %v5288_v8 }
  0x22   :  { %4478 = vmatpush3.bf16.msra.mxu0 %v5036_v14  ;;  %4481 = vmatprep.mubr.msk.bf16.mxu0 %vm5195_vm0, %v5194_v1 }
  0x23   :  { %4479 = vmatprep.subr.bf16.mxu0 %v5194_v1 }
  0x26   :  { %4480 = vmatpush3.bf16.msra.mxu0 %v5037_v15 }
  0x27   :  { %4511 = vmatprep.subr.bf16.mxu0 %v5194_v1 }
  0x29   :  { %4482 = vmatmul.mubr.msk.bf16.vlgmr.msra.gmra.mrb[16].mxu0 %vm85_vm1, %v5288_v8 }
  0x2a   :  { %4485 = vmatprep.mubr.msk.bf16.mxu0 %vm5195_vm0, %v5194_v1 }
  0x31   :  { %4486 = vmatmul.mubr.msk.bf16.gmra.mrb[20].mxu0 %vm85_vm1, %v5293_v10 }
  0x32   :  { %4489 = vmatprep.mubr.msk.bf16.mxu0 %vm5195_vm0, %v5194_v1 }
  0x39   :  { %4490 = vmatmul.mubr.msk.bf16.gmra.mrb[24].mxu0 %vm85_vm1, %v5312_v13 }
  0x3a   :  { %4513 = vmatprep.mubr.msk.bf16.mxu0 %vm5195_vm0, %v5194_v1 }
  0xdc   :  { %v129_v16 = vpop.f32.mrb[0].mxu0 }
  0xdd   :  { %v217_v18 = vpop.f32.mrb[0].mxu1  ;;  %v4451_v19 = vpop.f32.mrb[1].mxu0  ;;  %v130_v56 = vadd.f32 %v5367_v31, %v129_v16 }
  0xde   :  { %v4471_v20 = vpop.f32.mrb[1].mxu1  ;;  %v5356_v21 = vpop.f32.mrb[2].mxu0  ;;  %v218_v63 = vadd.f32 %v5354_v17, %v217_v18 }
  0xdf   :  { %v220_v22 = vpop.f32.mrb[2].mxu1  ;;  %v4452_v23 = vpop.f32.mrb[3].mxu0  ;;  %v312_v62 = vpack.c.bf16 %v130_v56, %v130_v56  ;;  %v133_v6 = vadd.f32 %v5367_v31, %v5356_v21 }
  0xe0   :  { %v221_v24 = vadd.f32 %v5354_v17, %v220_v22  ;;  %v4472_v25 = vpop.f32.mrb[3].mxu1  ;;  %v320_v5 = vpack.c.bf16 %v218_v63, %v218_v63 }
  0xe1   :  { %v313_v16 = vpack.c.bf16 %v133_v6, %v133_v6 }
  0xe2   :  { %v321_v26 = vpack.c.bf16 %v221_v24, %v221_v24  ;;  %v421_v15 = vsel %vm324_vm2, %v320_v5, 0 }
  0xe4   :  { %v467_v27 = vsel %vm324_vm2, %v321_v26, 0  ;;  %v5360_v28 = vpop.f32.mrb[4].mxu0 }
  0xe5   :  { %v5362_v29 = vpop.f32.mrb[4].mxu1  ;;  %4512 = vmatpush3.bf16.xpose.msra.mxu0 %v467_v27  ;;  %v4455_v30 = vpop.f32.mrb[5].mxu0  ;;  %v138_v21 = vadd.f32 %v5367_v31, %v5360_v28 }
  0xe6   :  { %v4475_v32 = vpop.f32.mrb[5].mxu1  ;;  %v140_v33 = vpop.f32.mrb[6].mxu0  ;;  %4523 = vmatprep.subr.bf16.mxu0 %v5194_v1  ;;  %v226_v18 = vadd.f32 %v5354_v17, %v5362_v29 }
  0xe7   :  { %v141_v34 = vadd.f32 %v5367_v31, %v140_v33  ;;  %v228_v35 = vpop.f32.mrb[6].mxu1  ;;  %v4456_v36 = vpop.f32.mrb[7].mxu0  ;;  %v314_v26 = vpack.c.bf16 %v138_v21, %v138_v21 }
  0xe8   :  { %v229_v37 = vadd.f32 %v5354_v17, %v228_v35  ;;  %v4476_v38 = vpop.f32.mrb[7].mxu1  ;;  %v322_v22 = vpack.c.bf16 %v226_v18, %v226_v18 }
  0xe9   :  { %v315_v39 = vpack.c.bf16 %v141_v34, %v141_v34 }
  0xea   :  { %v323_v40 = vpack.c.bf16 %v229_v37, %v229_v37  ;;  %v513_v27 = vsel %vm324_vm2, %v322_v22, 0 }
  0xec   :  { %v559_v41 = vsel %vm324_vm2, %v323_v40, 0  ;;  %4514 = vmatmul.mubr.msk.bf16.vlgmr.msra.gmra.mrb[28].mxu0 %vm324_vm2, %v315_v39  ;;  %v5374_v42 = vpop.f32.mrb[8].mxu0 }
  0xed   :  { %4524 = vmatpush3.bf16.xpose.msra.mxu0 %v559_v41  ;;  %v4459_v43 = vpop.f32.mrb[9].mxu0  ;;  %4525 = vmatprep.mubr.msk.bf16.mxu0 %vm5195_vm0, %v5194_v1  ;;  %v146_v28 = vadd.f32 %v5367_v31, %v5374_v42 }
  0xee   :  { %v148_v44 = vpop.f32.mrb[10].mxu0  ;;  %4535 = vmatprep.subr.bf16.mxu0 %v5194_v1 }
  0xef   :  { %v149_v45 = vadd.f32 %v5367_v31, %v148_v44  ;;  %v4460_v46 = vpop.f32.mrb[11].mxu0  ;;  %v316_v34 = vpack.c.bf16 %v146_v28, %v146_v28 }
  0xf1   :  { %v317_v47 = vpack.c.bf16 %v149_v45, %v149_v45 }
  0xf4   :  { %4526 = vmatmul.mubr.msk.bf16.vlgmr.msra.gmra.mrb[32].mxu0 %vm324_vm2, %v317_v47  ;;  %v209_v48 = vpop.f32.mrb[12].mxu0 }
  0xf5   :  { %v210_v49 = vadd.f32 %v5354_v17, %v209_v48  ;;  %v4467_v50 = vpop.f32.mrb[13].mxu0  ;;  %4537 = vmatprep.mubr.msk.bf16.mxu0 %vm5195_vm0, %v5194_v1 }
  0xf6   :  { %v212_v51 = vpop.f32.mrb[14].mxu0 }
  0xf7   :  { %v318_v52 = vpack.c.bf16 %v210_v49, %v210_v49  ;;  %v4468_v53 = vpop.f32.mrb[15].mxu0  ;;  %v213_v55 = vadd.f32 %v5354_v17, %v212_v51 }
  0xf9   :  { %v329_v54 = vsel %vm324_vm2, %v318_v52, 0  ;;  %v319_v59 = vpack.c.bf16 %v213_v55, %v213_v55 }
  0xfa   :  { %4494 = vmatpush3.bf16.xpose.msra.mxu1 %v329_v54 }
  0xfb   :  { %4499 = vmatprep.subr.bf16.mxu1 %v5194_v1  ;;  %v375_v3 = vsel %vm324_vm2, %v319_v59, 0 }
  0xfc   :  { %v289_v58 = vpop.f32.mrb[16].mxu0 }
  0xfd   :  { %v4483_v60 = vpop.f32.mrb[17].mxu0  ;;  %v290_v29 = vadd.f32 %v4103_v57, %v289_v58 }
  0xfe   :  { %v292_v61 = vpop.f32.mrb[18].mxu0 }
  0xff   :  { %v293_v0 = vadd.f32 %v4103_v57, %v292_v61  ;;  %v4484_v2 = vpop.f32.mrb[19].mxu0  ;;  %v679_v33 = vpack.c.bf16 %v290_v29, %v290_v29 }
 0x101   :  { %4496 = vmatmul.mubr.msk.bf16.vlgmr.msra.gmra.mrb[8].mxu1 %vm324_vm2, %v312_v62  ;;  %v680_v4 = vpack.c.bf16 %v293_v0, %v293_v0  ;;  %v690_v35 = vsel %vm688_vm3, %v679_v33, 0 }
 0x102   :  { %4500 = vmatpush3.bf16.xpose.msra.mxu1 %v375_v3  ;;  %4501 = vmatprep.mubr.msk.bf16.mxu1 %vm5195_vm0, %v5194_v1 }
 0x103   :  { %4505 = vmatprep.subr.bf16.mxu1 %v5194_v1  ;;  %v736_v7 = vsel %vm688_vm3, %v680_v4, 0 }
 0x104   :  { %v297_v9 = vpop.f32.mrb[20].mxu0  ;;  %4536 = vmatpush3.bf16.msra.mxu0 %v736_v7 }
 0x105   :  { %v5400_v11 = vadd.f32 %v4103_v57, %v297_v9  ;;  %v4487_v12 = vpop.f32.mrb[21].mxu0  ;;  %4547 = vmatprep.subr.bf16.mxu0 %v5194_v1 }
 0x106   :  { %v300_v14 = vpop.f32.mrb[22].mxu0 }
 0x107   :  { %v5406_v19 = vadd.f32 %v4103_v57, %v300_v14  ;;  %v4488_v20 = vpop.f32.mrb[23].mxu0 }
 0x109   :  { %4502 = vmatmul.mubr.msk.bf16.vlgmr.msra.gmra.mrb[12].mxu1 %vm324_vm2, %v313_v16 }
 0x10a   :  { %4506 = vmatpush3.bf16.xpose.msra.mxu1 %v421_v15  ;;  %4507 = vmatprep.mubr.msk.bf16.mxu1 %vm5195_vm0, %v5194_v1 }
 0x10b   :  { %4517 = vmatprep.subr.bf16.mxu1 %v5194_v1 }
 0x10c   :  { %v305_v23 = vpop.f32.mrb[24].mxu0 }
 0x10d   :  { %v5414_v24 = vadd.f32 %v4103_v57, %v305_v23  ;;  %v4491_v25 = vpop.f32.mrb[25].mxu0 }
 0x10e   :  { %v308_v17 = vpop.f32.mrb[26].mxu0 }
 0x10f   :  { %v5417_v30 = vadd.f32 %v4103_v57, %v308_v17  ;;  %v4492_v32 = vpop.f32.mrb[27].mxu0 }
 0x111   :  { %4508 = vmatmul.mubr.msk.bf16.vlgmr.msra.gmra.mrb[16].mxu1 %vm324_vm2, %v314_v26 }
 0x112   :  { %4518 = vmatpush3.bf16.xpose.msra.mxu1 %v513_v27  ;;  %4519 = vmatprep.mubr.msk.bf16.mxu1 %vm5195_vm0, %v5194_v1 }
 0x113   :  { %4529 = vmatprep.subr.bf16.mxu1 %v5194_v1 }
 0x119   :  { %4520 = vmatmul.mubr.msk.bf16.vlgmr.msra.gmra.mrb[20].mxu1 %vm324_vm2, %v316_v34 }
 0x11a   :  { %4530 = vmatpush3.bf16.msra.mxu1 %v690_v35  ;;  %4531 = vmatprep.mubr.msk.bf16.mxu1 %vm5195_vm0, %v5194_v1 }
 0x11b   :  { %4541 = vmatprep.subr.bf16.mxu1 %v5194_v1 }
 0x1bf   :  { %v503_v36 = vpop.f32.mrb[28].mxu0 }
 0x1c0   :  { %v4515_v37 = vpop.f32.mrb[29].mxu0  ;;  %v604_v59 = vmul.f32 0.35355338, %v503_v36 }
 0x1c1   :  { %v506_v38 = vpop.f32.mrb[30].mxu0 }
 0x1c2   :  { %v4516_v39 = vpop.f32.mrb[31].mxu0  ;;  %v616_v63 = vsel %vm324_vm2, %v604_v59, -inf }
 0x1c7   :  { %v595_v40 = vpop.f32.mrb[32].mxu0 }
 0x1c8   :  { %v4527_v31 = vpop.f32.mrb[33].mxu0  ;;  %v606_v62 = vmul.f32 0.35355338, %v595_v40 }
 0x1c9   :  { %v598_v41 = vpop.f32.mrb[34].mxu0 }
 0x1ca   :  { %v4528_v42 = vpop.f32.mrb[35].mxu0  ;;  %v622_v7 = vsel %vm324_vm2, %v606_v62, -inf }
 0x1d4   :  { %v365_v43 = vpop.f32.mrb[8].mxu1 }
 0x1d5   :  { %v601_v44 = vmul.f32 0.35355338, %v365_v43  ;;  %v4497_v45 = vpop.f32.mrb[9].mxu1 }
 0x1d6   :  { %v368_v46 = vpop.f32.mrb[10].mxu1 }
 0x1d7   :  { %v4498_v47 = vpop.f32.mrb[11].mxu1  ;;  %v607_v48 = vsel %vm324_vm2, %v601_v44, -inf }
 0x1d8   :  { %608 = vmax.xlane.f32.xlu0 %v607_v48  ;;  %v681_v48 = vpack.c.bf16 %v5400_v11, %v5400_v11 }
 0x1dc   :  { %v411_v49 = vpop.f32.mrb[12].mxu1 }
 0x1dd   :  { %v602_v50 = vmul.f32 0.35355338, %v411_v49  ;;  %v4503_v51 = vpop.f32.mrb[13].mxu1 }
 0x1de   :  { %v414_v52 = vpop.f32.mrb[14].mxu1  ;;  %v782_v51 = vsel %vm688_vm3, %v681_v48, 0 }
 0x1df   :  { %v4504_v53 = vpop.f32.mrb[15].mxu1  ;;  %v610_v54 = vsel %vm324_vm2, %v602_v50, -inf }
 0x1e0   :  { %611 = vmax.xlane.f32.xlu0 %v610_v54  ;;  %v682_v54 = vpack.c.bf16 %v5406_v19, %v5406_v19  ;;  %v683_v19 = vpack.c.bf16 %v5414_v24, %v5414_v24 }
 0x1e4   :  { %v457_v55 = vpop.f32.mrb[16].mxu1 }
 0x1e5   :  { %v603_v56 = vmul.f32 0.35355338, %v457_v55  ;;  %v4509_v57 = vpop.f32.mrb[17].mxu1 }
 0x1e6   :  { %v460_v58 = vpop.f32.mrb[18].mxu1  ;;  %v828_v57 = vsel %vm688_vm3, %v682_v54, 0 }
 0x1e7   :  { %v4510_v60 = vpop.f32.mrb[19].mxu1  ;;  %v613_v61 = vsel %vm324_vm2, %v603_v56, -inf }
 0x1e8   :  { %614 = vmax.xlane.f32.xlu1 %v613_v61 }
 0x1ec   :  { %v549_v0 = vpop.f32.mrb[20].mxu1  ;;  %617 = vmax.xlane.f32.xlu1 %v616_v63 }
 0x1ed   :  { %v605_v2 = vmul.f32 0.35355338, %v549_v0  ;;  %v4521_v3 = vpop.f32.mrb[21].mxu1  ;;  %v874_v0 = vsel %vm688_vm3, %v683_v19, 0 }
 0x1ee   :  { %v552_v4 = vpop.f32.mrb[22].mxu1 }
 0x1ef   :  { %v4522_v5 = vpop.f32.mrb[23].mxu1  ;;  %v619_v6 = vsel %vm324_vm2, %v605_v2, -inf }
 0x1f0   :  { %620 = vmax.xlane.f32.xlu0 %v619_v6  ;;  %623 = vmax.xlane.f32.xlu1 %v622_v7 }
 0x265   :  { %v609_v9 = vpop.xlane.xlu0 %608 }
 0x266   :  { %v625_v12 = vsub.f32 %v601_v44, %v609_v9 }
 0x268   :  { %v631_v14 = vmul.f32 1.442695, %v625_v12 }
 0x26a   :  { %5056 = vpow2.f32 %v631_v14  ;;  %v965_v14 = vld [vmem:[%s6121_s7] sm:$0xf] }
 0x26d   :  { %v612_v15 = vpop.xlane.xlu0 %611 }
 0x26e   :  { %v626_v16 = vsub.f32 %v602_v50, %v612_v15  ;;  %v976_v15 = vsel %vm688_vm3, %v965_v14, 0 }
 0x270   :  { %v633_v18 = vmul.f32 1.442695, %v626_v16  ;;  %v5040_v16 = vld [vmem:[%s6115_s1 + $0x10] sm:$0xff]  }
 0x272   :  { %5058 = vpow2.f32 %v633_v18  ;;  %v5041_v18 = vld [vmem:[%s6115_s1 + $0x18] sm:$0xff]  }
 0x274   :  { %v5057_v20 = vpop.eup %5056 }
 0x275   :  { %v615_v21 = vpop.xlane.xlu1 %614  ;;  %v643_v22 = vsel %vm324_vm2, %v5057_v20, 0.0 }
 0x276   :  { %v627_v23 = vsub.f32 %v603_v56, %v615_v21  ;;  %644 = vadd.xlane.f32.xlu0 %v643_v22  ;;  %v5043_v21 = vld [vmem:[%s6117_s3 + $0x18] sm:$0xff]  }
 0x278   :  { %v635_v25 = vmul.f32 1.442695, %v627_v23 }
 0x279   :  { %v618_v17 = vpop.xlane.xlu1 %617 }
 0x27a   :  { %5060 = vpow2.f32 %v635_v25  ;;  %v628_v26 = vsub.f32 %v604_v59, %v618_v17 }
 0x27c   :  { %v5059_v27 = vpop.eup %5058  ;;  %v637_v29 = vmul.f32 1.442695, %v628_v26 }
 0x27d   :  { %v621_v32 = vpop.xlane.xlu0 %620  ;;  %v624_v28 = vpop.xlane.xlu1 %623  ;;  %v646_v33 = vsel %vm324_vm2, %v5059_v27, 0.0 }
 0x27e   :  { %5062 = vpow2.f32 %v637_v29  ;;  %v629_v34 = vsub.f32 %v605_v2, %v621_v32  ;;  %v630_v35 = vsub.f32 %v606_v62, %v624_v28  ;;  %647 = vadd.xlane.f32.xlu1 %v646_v33  ;;  %v684_v2 = vpack.c.bf16 %v5417_v30, %v5417_v30 }
 0x280   :  { %v639_v36 = vmul.f32 1.442695, %v629_v34  ;;  %v641_v37 = vmul.f32 1.442695, %v630_v35  ;;  %v920_v6 = vsel %vm688_vm3, %v684_v2, 0  ;;  %v5039_v34 = vld [vmem:[%s6116_s2 + $0x18] sm:$0xff]  }
 0x282   :  { %5064 = vpow2.f32 %v639_v36 }
 0x283   :  { %5066 = vpow2.f32 %v641_v37 }
 0x284   :  { %v5061_v38 = vpop.eup %5060 }
 0x285   :  { %v649_v39 = vsel %vm324_vm2, %v5061_v38, 0.0 }
 0x286   :  { %650 = vadd.xlane.f32.xlu0 %v649_v39 }
 0x288   :  { %v5063_v40 = vpop.eup %5062 }
 0x289   :  { %v652_v31 = vsel %vm324_vm2, %v5063_v40, 0.0 }
 0x28a   :  { %653 = vadd.xlane.f32.xlu1 %v652_v31 }
 0x28c   :  { %v5065_v41 = vpop.eup %5064 }
 0x28d   :  { %v5067_v42 = vpop.eup %5066  ;;  %v655_v43 = vsel %vm324_vm2, %v5065_v41, 0.0 }
 0x28e   :  { %656 = vadd.xlane.f32.xlu0 %v655_v43  ;;  %v658_v44 = vsel %vm324_vm2, %v5067_v42, 0.0 }
 0x28f   :  { %659 = vadd.xlane.f32.xlu1 %v658_v44 }
 0x303   :  { %v645_v45 = vpop.xlane.xlu0 %644 }
 0x304   :  { %5068 = vrcp.f32 %v645_v45 }
 0x30b   :  { %v648_v46 = vpop.xlane.xlu1 %647 }
 0x30c   :  { %5070 = vrcp.f32 %v648_v46 }
 0x30e   :  { %v5069_v47 = vpop.eup %5068 }
 0x30f   :  { %v667_v49 = vmul.f32 %v5069_v47, %v5057_v20  ;;  %v5042_v20 = vld [vmem:[%s6117_s3 + $0x10] sm:$0xff]  }
 0x311   :  { %v673_v50 = vpack.c.bf16 %v667_v49, %v667_v49 }
 0x313   :  { %v651_v52 = vpop.xlane.xlu0 %650  ;;  %4532 = vmatmul.mubr.msk.bf16.vlgmr.msra.gmra.mrb[24].mxu1 %vm324_vm2, %v673_v50 }
 0x314   :  { %5072 = vrcp.f32 %v651_v52  ;;  %4542 = vmatpush3.bf16.msra.mxu1 %v782_v51  ;;  %4543 = vmatprep.mubr.msk.bf16.mxu1 %vm5195_vm0, %v5194_v1 }
 0x315   :  { %4553 = vmatprep.subr.bf16.mxu1 %v5194_v1 }
 0x316   :  { %v5071_v53 = vpop.eup %5070 }
 0x317   :  { %v668_v55 = vmul.f32 %v5071_v53, %v5059_v27  ;;  %v654_v11 = vpop.xlane.xlu1 %653  ;;  %v5038_v27 = vld [vmem:[%s6116_s2 + $0x10] sm:$0xff]  }
 0x318   :  { %5074 = vrcp.f32 %v654_v11 }
 0x319   :  { %v674_v56 = vpack.c.bf16 %v668_v55, %v668_v55 }
 0x31b   :  { %v657_v58 = vpop.xlane.xlu0 %656  ;;  %4538 = vmatmul.mubr.msk.bf16.vlgmr.msra.gmra.mrb[36].mxu0 %vm324_vm2, %v674_v56 }
 0x31c   :  { %5076 = vrcp.f32 %v657_v58  ;;  %4548 = vmatpush3.bf16.msra.mxu0 %v828_v57  ;;  %v660_v59 = vpop.xlane.xlu1 %659  ;;  %4549 = vmatprep.mubr.msk.bf16.mxu0 %vm5195_vm0, %v5194_v1 }
 0x31d   :  { %5078 = vrcp.f32 %v660_v59  ;;  %4559 = vmatprep.subr.bf16.mxu0 %v5194_v1 }
 0x31e   :  { %v5073_v60 = vpop.eup %5072 }
 0x31f   :  { %v669_v61 = vmul.f32 %v5073_v60, %v5061_v38 }
 0x321   :  { %v675_v62 = vpack.c.bf16 %v669_v61, %v669_v61 }
 0x322   :  { %v5075_v63 = vpop.eup %5074 }
 0x323   :  { %v670_v3 = vmul.f32 %v5075_v63, %v5063_v40  ;;  %4544 = vmatmul.mubr.msk.bf16.vlgmr.msra.gmra.mrb[28].mxu1 %vm324_vm2, %v675_v62 }
 0x324   :  { %4554 = vmatpush3.bf16.msra.mxu1 %v874_v0  ;;  %4555 = vmatprep.mubr.msk.bf16.mxu1 %vm5195_vm0, %v5194_v1 }
 0x325   :  { %v676_v4 = vpack.c.bf16 %v670_v3, %v670_v3  ;;  %4565 = vmatprep.subr.bf16.mxu1 %v5194_v1  ;;  %v5561_v3 = vld [vmem:[%s6120_s6 + $0x1] ss:$0 sm:$0xff] }
 0x326   :  { %v5077_v5 = vpop.eup %5076 }
 0x327   :  { %v5079_v24 = vpop.eup %5078  ;;  %v671_v7 = vmul.f32 %v5077_v5, %v5065_v41  ;;  %4550 = vmatmul.mubr.msk.bf16.vlgmr.msra.gmra.mrb[40].mxu0 %vm324_vm2, %v676_v4 }
 0x328   :  { %4560 = vmatpush3.bf16.msra.mxu0 %v920_v6  ;;  %4561 = vmatprep.mubr.msk.bf16.mxu0 %vm5195_vm0, %v5194_v1  ;;  %v672_v30 = vmul.f32 %v5079_v24, %v5067_v42 }
 0x329   :  { %v677_v9 = vpack.c.bf16 %v671_v7, %v671_v7  ;;  %4579 = vmatprep.subr.bf16.mxu0 %v5194_v1 }
 0x32a   :  { %v678_v12 = vpack.c.bf16 %v672_v30, %v672_v30 }
 0x32b   :  { %4556 = vmatmul.mubr.msk.bf16.vlgmr.msra.gmra.mrb[32].mxu1 %vm324_vm2, %v677_v9 }
 0x32c   :  { %4567 = vmatprep.mubr.msk.bf16.mxu1 %vm5195_vm0, %v5194_v1  ;;  %4566 = vmatpush3.bf16.msra.mxu1 %v976_v15 }
 0x32d   :  { %4595 = vmatprep.subr.bf16.mxu1 %v5194_v1 }
 0x32f   :  { %4562 = vmatmul.mubr.msk.bf16.vlgmr.msra.gmra.mrb[44].mxu0 %vm324_vm2, %v678_v12 }
 0x330   :  { %4583 = vmatprep.mubr.msk.bf16.mxu0 %vm5195_vm0, %v5194_v1  ;;  %4580 = vmatpush3.bf16.msra.mxu0 %v5040_v16 }
 0x331   :  { %4581 = vmatprep.subr.bf16.mxu0 %v5194_v1 }
 0x334   :  { %4582 = vmatpush3.bf16.msra.mxu0 %v5041_v18 }
 0x335   :  { %4611 = vmatprep.subr.bf16.mxu0 %v5194_v1 }
 0x337   :  { %4584 = vmatmul.mubr.msk.bf16.vlgmr.msra.gmra.mrb[48].mxu0 %vm85_vm1, %v5288_v8 }
 0x338   :  { %4587 = vmatprep.mubr.msk.bf16.mxu0 %vm5195_vm0, %v5194_v1  ;;  %4612 = vmatpush3.bf16.msra.mxu0 %v5042_v20  ;;  %v4140_v20 = vld [vmem:[%s6119_s5 + $0x1] ss:$0 sm:$0xff] }
 0x339   :  { %4613 = vmatprep.subr.bf16.mxu0 %v5194_v1 }
 0x33c   :  { %4614 = vmatpush3.bf16.msra.mxu0 %v5043_v21 }
 0x33d   :  { %4633 = vmatprep.subr.bf16.mxu0 %v5194_v1 }
 0x33f   :  { %4588 = vmatmul.mubr.msk.bf16.gmra.mrb[52].mxu0 %vm85_vm1, %v5293_v10 }
 0x340   :  { %4591 = vmatprep.mubr.msk.bf16.mxu0 %vm5195_vm0, %v5194_v1 }
 0x347   :  { %4592 = vmatmul.mubr.msk.bf16.gmra.mrb[56].mxu0 %vm85_vm1, %v5312_v13 }
 0x348   :  { %4615 = vmatprep.mubr.msk.bf16.mxu0 %vm5195_vm0, %v5194_v1 }
 0x34f   :  { %4616 = vmatmul.mubr.msk.bf16.vlgmr.msra.gmra.mrb[60].mxu0 %vm85_vm1, %v5288_v8 }
 0x350   :  { %4619 = vmatprep.mubr.msk.bf16.mxu0 %vm5195_vm0, %v5194_v1 }
 0x357   :  { %4620 = vmatmul.mubr.msk.bf16.gmra.mrb[64].mxu0 %vm85_vm1, %v5293_v10 }
 0x358   :  { %4623 = vmatprep.mubr.msk.bf16.mxu0 %vm5195_vm0, %v5194_v1 }
 0x35f   :  { %4624 = vmatmul.mubr.msk.bf16.gmra.mrb[68].mxu0 %vm85_vm1, %v5312_v13 }
 0x360   :  { %4635 = vmatprep.mubr.msk.bf16.mxu0 %vm5195_vm0, %v5194_v1 }
 0x3e6   :  { %v726_v22 = vpop.f32.mrb[24].mxu1 }
 0x3e7   :  { %v4533_v23 = vpop.f32.mrb[25].mxu1 }
 0x3e8   :  { %v729_v25 = vpop.f32.mrb[26].mxu1 }
 0x3e9   :  { %v4534_v17 = vpop.f32.mrb[27].mxu1 }
 0x3ea   :  { %v4129_v17 = vld [vmem:[%s6118_s4 + $0x1] ss:$0 sm:$0xff] }
 0x3ee   :  { %v772_v26 = vpop.f32.mrb[36].mxu0 }
 0x3ef   :  { %v962_v29 = vpack.c.bf16 %v772_v26, %v726_v22  ;;  %v4539_v32 = vpop.f32.mrb[37].mxu0 }
 0x3f0   :  { %v775_v28 = vpop.f32.mrb[38].mxu0 }
 0x3f1   :  { %v4540_v33 = vpop.f32.mrb[39].mxu0  ;;  %4568 = vmatmul.mubr.msk.bf16.vlgmr.msra.gmra.mrb[36].mxu1 %vm324_vm2, %v962_v29 }
 0x3f2   :  { %4571 = vmatprep.mubr.msk.bf16.mxu1 %vm5195_vm0, %v5194_v1  ;;  %4596 = vmatpush3.bf16.msra.mxu1 %v5038_v27 }
 0x3f3   :  { %4597 = vmatprep.subr.bf16.mxu1 %v5194_v1 }
 0x3f6   :  { %v818_v35 = vpop.f32.mrb[28].mxu1  ;;  %4598 = vmatpush3.bf16.msra.mxu1 %v5039_v34 }
 0x3f7   :  { %v4545_v36 = vpop.f32.mrb[29].mxu1  ;;  %4627 = vmatprep.subr.bf16.mxu1 %v5194_v1 }
 0x3f8   :  { %v821_v37 = vpop.f32.mrb[30].mxu1 }
 0x3f9   :  { %v4546_v38 = vpop.f32.mrb[31].mxu1 }
 0x3fa   :  { %v864_v39 = vpop.f32.mrb[40].mxu0 }
 0x3fb   :  { %v963_v40 = vpack.c.bf16 %v864_v39, %v818_v35  ;;  %v4551_v31 = vpop.f32.mrb[41].mxu0 }
 0x3fc   :  { %v867_v41 = vpop.f32.mrb[42].mxu0 }
 0x3fd   :  { %v4552_v42 = vpop.f32.mrb[43].mxu0  ;;  %4572 = vmatmul.mubr.msk.bf16.gmra.mrb[40].mxu1 %vm324_vm2, %v963_v40 }
 0x3fe   :  { %v910_v43 = vpop.f32.mrb[32].mxu1  ;;  %4575 = vmatprep.mubr.msk.bf16.mxu1 %vm5195_vm0, %v5194_v1 }
 0x3ff   :  { %v4557_v44 = vpop.f32.mrb[33].mxu1 }
 0x400   :  { %v913_v45 = vpop.f32.mrb[34].mxu1 }
 0x401   :  { %v4558_v46 = vpop.f32.mrb[35].mxu1 }
 0x402   :  { %v956_v47 = vpop.f32.mrb[44].mxu0 }
 0x403   :  { %v964_v48 = vpack.c.bf16 %v956_v47, %v910_v43  ;;  %v4563_v49 = vpop.f32.mrb[45].mxu0 }
 0x404   :  { %v959_v50 = vpop.f32.mrb[46].mxu0 }
 0x405   :  { %v4564_v51 = vpop.f32.mrb[47].mxu0  ;;  %4576 = vmatmul.mubr.msk.bf16.gmra.mrb[44].mxu1 %vm324_vm2, %v964_v48 }
 0x406   :  { %4599 = vmatprep.mubr.msk.bf16.mxu1 %vm5195_vm0, %v5194_v1 }
 0x40a   :  { %v1100_v52 = vpop.f32.mrb[48].mxu0 }
 0x40b   :  { %v4585_v53 = vpop.f32.mrb[49].mxu0  ;;  %v1101_v33 = vadd.f32 %v4129_v17, %v1100_v52 }
 0x40c   :  { %v1103_v54 = vpop.f32.mrb[50].mxu0 }
 0x40d   :  { %4600 = vmatmul.mubr.msk.bf16.vlgmr.msra.gmra.mrb[48].mxu1 %vm85_vm1, %v5288_v8  ;;  %v4586_v55 = vpop.f32.mrb[51].mxu0  ;;  %v1287_v36 = vpack.c.bf16 %v1101_v33, %v1101_v33  ;;  %v1104_v37 = vadd.f32 %v4129_v17, %v1103_v54 }
 0x40e   :  { %4603 = vmatprep.mubr.msk.bf16.mxu1 %vm5195_vm0, %v5194_v1 }
 0x40f   :  { %v1288_v43 = vpack.c.bf16 %v1104_v37, %v1104_v37 }
 0x412   :  { %v1108_v11 = vpop.f32.mrb[52].mxu0 }
 0x413   :  { %v4589_v56 = vpop.f32.mrb[53].mxu0  ;;  %v1109_v46 = vadd.f32 %v4129_v17, %v1108_v11 }
 0x414   :  { %v1111_v57 = vpop.f32.mrb[54].mxu0 }
 0x415   :  { %4604 = vmatmul.mubr.msk.bf16.gmra.mrb[52].mxu1 %vm85_vm1, %v5293_v10  ;;  %v4590_v58 = vpop.f32.mrb[55].mxu0  ;;  %v1112_v48 = vadd.f32 %v4129_v17, %v1111_v57  ;;  %v1289_v50 = vpack.c.bf16 %v1109_v46, %v1109_v46 }
 0x416   :  { %4607 = vmatprep.mubr.msk.bf16.mxu1 %vm5195_vm0, %v5194_v1 }
 0x417   :  { %v1290_v58 = vpack.c.bf16 %v1112_v48, %v1112_v48 }
 0x41a   :  { %v5550_v59 = vpop.f32.mrb[56].mxu0 }
 0x41b   :  { %v4593_v60 = vpop.f32.mrb[57].mxu0 }
 0x41c   :  { %v5552_v19 = vpop.f32.mrb[58].mxu0 }
 0x41d   :  { %4608 = vmatmul.mubr.msk.bf16.gmra.mrb[56].mxu1 %vm85_vm1, %v5312_v13  ;;  %v4594_v61 = vpop.f32.mrb[59].mxu0 }
 0x41e   :  { %4629 = vmatprep.mubr.msk.bf16.mxu1 %vm5195_vm0, %v5194_v1  ;;  %v1117_v61 = vadd.f32 %v4129_v17, %v5550_v59 }
 0x420   :  { %v1291_v59 = vpack.c.bf16 %v1117_v61, %v1117_v61 }
 0x422   :  { %v5554_v62 = vpop.f32.mrb[60].mxu0 }
 0x423   :  { %v4617_v63 = vpop.f32.mrb[61].mxu0  ;;  %v1265_v56 = vadd.f32 %v5561_v3, %v5554_v62 }
 0x424   :  { %v5556_v0 = vpop.f32.mrb[62].mxu0 }
 0x425   :  { %v4618_v2 = vpop.f32.mrb[63].mxu0  ;;  %v1268_v63 = vadd.f32 %v5561_v3, %v5556_v0  ;;  %v1653_v62 = vpack.c.bf16 %v1265_v56, %v1265_v56 }
 0x427   :  { %v1663_v0 = vsel %vm688_vm3, %v1653_v62, 0 }
 0x42a   :  { %v1272_v4 = vpop.f32.mrb[64].mxu0 }
 0x42b   :  { %v5564_v5 = vadd.f32 %v5561_v3, %v1272_v4  ;;  %v4621_v24 = vpop.f32.mrb[65].mxu0  ;;  %v1120_v4 = vadd.f32 %v4129_v17, %v5552_v19 }
 0x42c   :  { %v1275_v6 = vpop.f32.mrb[66].mxu0  ;;  %v1654_v24 = vpack.c.bf16 %v1268_v63, %v1268_v63 }
 0x42d   :  { %v5567_v7 = vadd.f32 %v5561_v3, %v1275_v6  ;;  %v4622_v30 = vpop.f32.mrb[67].mxu0 }
 0x42e   :  { %v1709_v6 = vsel %vm688_vm3, %v1654_v24, 0 }
 0x432   :  { %v1280_v9 = vpop.f32.mrb[68].mxu0 }
 0x433   :  { %v5570_v12 = vadd.f32 %v5561_v3, %v1280_v9  ;;  %v4625_v14 = vpop.f32.mrb[69].mxu0 }
 0x434   :  { %v1283_v15 = vpop.f32.mrb[70].mxu0 }
 0x435   :  { %v5573_v16 = vadd.f32 %v5561_v3, %v1283_v15  ;;  %v4626_v18 = vpop.f32.mrb[71].mxu0  ;;  %v1292_v3 = vpack.c.bf16 %v1120_v4, %v1120_v4 }
 0x4e0   :  { %v1182_v21 = vpop.f32.mrb[48].mxu1 }
 0x4e1   :  { %v1183_v22 = vadd.f32 %v4140_v20, %v1182_v21  ;;  %v4601_v23 = vpop.f32.mrb[49].mxu1 }
 0x4e2   :  { %v1185_v25 = vpop.f32.mrb[50].mxu1 }
 0x4e3   :  { %v1293_v26 = vpack.c.bf16 %v1183_v22, %v1183_v22  ;;  %v1186_v27 = vadd.f32 %v4140_v20, %v1185_v25  ;;  %v4602_v29 = vpop.f32.mrb[51].mxu1 }
 0x4e5   :  { %v1303_v32 = vsel %vm324_vm2, %v1293_v26, 0  ;;  %v1294_v28 = vpack.c.bf16 %v1186_v27, %v1186_v27 }
 0x4e6   :  { %4628 = vmatpush3.bf16.xpose.msra.mxu1 %v1303_v32 }
 0x4e7   :  { %v1349_v34 = vsel %vm324_vm2, %v1294_v28, 0  ;;  %4639 = vmatprep.subr.bf16.mxu1 %v5194_v1 }
 0x4e8   :  { %v1190_v35 = vpop.f32.mrb[52].mxu1  ;;  %4634 = vmatpush3.bf16.xpose.msra.mxu0 %v1349_v34 }
 0x4e9   :  { %v1191_v38 = vadd.f32 %v4140_v20, %v1190_v35  ;;  %v4605_v39 = vpop.f32.mrb[53].mxu1  ;;  %4645 = vmatprep.subr.bf16.mxu0 %v5194_v1 }
 0x4ea   :  { %v1193_v40 = vpop.f32.mrb[54].mxu1 }
 0x4eb   :  { %v1295_v31 = vpack.c.bf16 %v1191_v38, %v1191_v38  ;;  %v1194_v41 = vadd.f32 %v4140_v20, %v1193_v40  ;;  %v4606_v42 = vpop.f32.mrb[55].mxu1 }
 0x4ed   :  { %v1395_v44 = vsel %vm324_vm2, %v1295_v31, 0  ;;  %v1296_v45 = vpack.c.bf16 %v1194_v41, %v1194_v41  ;;  %4630 = vmatmul.mubr.msk.bf16.vlgmr.msra.gmra.mrb[60].mxu1 %vm324_vm2, %v1287_v36 }
 0x4ee   :  { %4640 = vmatpush3.bf16.xpose.msra.mxu1 %v1395_v44  ;;  %4641 = vmatprep.mubr.msk.bf16.mxu1 %vm5195_vm0, %v5194_v1 }
 0x4ef   :  { %v1441_v47 = vsel %vm324_vm2, %v1296_v45, 0  ;;  %4636 = vmatmul.mubr.msk.bf16.vlgmr.msra.gmra.mrb[72].mxu0 %vm324_vm2, %v1288_v43  ;;  %4651 = vmatprep.subr.bf16.mxu1 %v5194_v1 }
 0x4f0   :  { %v1198_v49 = vpop.f32.mrb[56].mxu1  ;;  %4646 = vmatpush3.bf16.xpose.msra.mxu0 %v1441_v47  ;;  %4647 = vmatprep.mubr.msk.bf16.mxu0 %vm5195_vm0, %v5194_v1 }
 0x4f1   :  { %v1199_v51 = vadd.f32 %v4140_v20, %v1198_v49  ;;  %v4609_v52 = vpop.f32.mrb[57].mxu1  ;;  %4657 = vmatprep.subr.bf16.mxu0 %v5194_v1 }
 0x4f2   :  { %v1201_v53 = vpop.f32.mrb[58].mxu1 }
 0x4f3   :  { %v1297_v54 = vpack.c.bf16 %v1199_v51, %v1199_v51  ;;  %v1202_v55 = vadd.f32 %v4140_v20, %v1201_v53  ;;  %v4610_v11 = vpop.f32.mrb[59].mxu1 }
 0x4f5   :  { %v1487_v57 = vsel %vm324_vm2, %v1297_v54, 0  ;;  %v1298_v60 = vpack.c.bf16 %v1202_v55, %v1202_v55  ;;  %4642 = vmatmul.mubr.msk.bf16.vlgmr.msra.gmra.mrb[64].mxu1 %vm324_vm2, %v1289_v50 }
 0x4f6   :  { %4652 = vmatpush3.bf16.xpose.msra.mxu1 %v1487_v57  ;;  %4653 = vmatprep.mubr.msk.bf16.mxu1 %vm5195_vm0, %v5194_v1 }
 0x4f7   :  { %v1533_v2 = vsel %vm324_vm2, %v1298_v60, 0  ;;  %4648 = vmatmul.mubr.msk.bf16.vlgmr.msra.gmra.mrb[76].mxu0 %vm324_vm2, %v1290_v58  ;;  %4663 = vmatprep.subr.bf16.mxu1 %v5194_v1 }
 0x4f8   :  { %4658 = vmatpush3.bf16.xpose.msra.mxu0 %v1533_v2  ;;  %4659 = vmatprep.mubr.msk.bf16.mxu0 %vm5195_vm0, %v5194_v1 }
 0x4f9   :  { %4669 = vmatprep.subr.bf16.mxu0 %v5194_v1 }
 0x4fd   :  { %4654 = vmatmul.mubr.msk.bf16.vlgmr.msra.gmra.mrb[68].mxu1 %vm324_vm2, %v1291_v59 }
 0x4fe   :  { %4664 = vmatpush3.bf16.msra.mxu1 %v1663_v0  ;;  %4665 = vmatprep.mubr.msk.bf16.mxu1 %vm5195_vm0, %v5194_v1 }
 0x4ff   :  { %4660 = vmatmul.mubr.msk.bf16.vlgmr.msra.gmra.mrb[80].mxu0 %vm324_vm2, %v1292_v3  ;;  %4675 = vmatprep.subr.bf16.mxu1 %v5194_v1 }
 0x500   :  { %4670 = vmatpush3.bf16.msra.mxu0 %v1709_v6  ;;  %4671 = vmatprep.mubr.msk.bf16.mxu0 %vm5195_vm0, %v5194_v1 }
 0x501   :  { %4681 = vmatprep.subr.bf16.mxu0 %v5194_v1 }
 0x5c0   :  { %v1339_v19 = vpop.f32.mrb[60].mxu1 }
 0x5c1   :  { %v1575_v30 = vmul.f32 0.35355338, %v1339_v19  ;;  %v4631_v9 = vpop.f32.mrb[61].mxu1 }
 0x5c2   :  { %v1342_v14 = vpop.f32.mrb[62].mxu1  ;;  %v1385_v15 = vpop.f32.mrb[72].mxu0 }
 0x5c3   :  { %v1576_v18 = vmul.f32 0.35355338, %v1385_v15  ;;  %v4632_v20 = vpop.f32.mrb[63].mxu1  ;;  %v4637_v21 = vpop.f32.mrb[73].mxu0  ;;  %v1581_v22 = vsel %vm324_vm2, %v1575_v30, -inf }
 0x5c4   :  { %1582 = vmax.xlane.f32.xlu0 %v1581_v22  ;;  %v1388_v23 = vpop.f32.mrb[74].mxu0 }
 0x5c5   :  { %v4638_v25 = vpop.f32.mrb[75].mxu0  ;;  %v1584_v17 = vsel %vm324_vm2, %v1576_v18, -inf }
 0x5c6   :  { %1585 = vmax.xlane.f32.xlu1 %v1584_v17 }
 0x5c8   :  { %v1431_v26 = vpop.f32.mrb[64].mxu1 }
 0x5c9   :  { %v1577_v27 = vmul.f32 0.35355338, %v1431_v26  ;;  %v4643_v29 = vpop.f32.mrb[65].mxu1 }
 0x5ca   :  { %v1434_v32 = vpop.f32.mrb[66].mxu1  ;;  %v1477_v28 = vpop.f32.mrb[76].mxu0 }
 0x5cb   :  { %v1578_v33 = vmul.f32 0.35355338, %v1477_v28  ;;  %v4644_v34 = vpop.f32.mrb[67].mxu1  ;;  %v4649_v35 = vpop.f32.mrb[77].mxu0  ;;  %v1587_v36 = vsel %vm324_vm2, %v1577_v27, -inf  ;;  %v1655_v32 = vpack.c.bf16 %v5564_v5, %v5564_v5 }
 0x5cc   :  { %1588 = vmax.xlane.f32.xlu0 %v1587_v36  ;;  %v1480_v37 = vpop.f32.mrb[78].mxu0  ;;  %v1656_v34 = vpack.c.bf16 %v5567_v7, %v5567_v7 }
 0x5cd   :  { %v4650_v38 = vpop.f32.mrb[79].mxu0  ;;  %v1590_v39 = vsel %vm324_vm2, %v1578_v33, -inf  ;;  %v1755_v37 = vsel %vm688_vm3, %v1655_v32, 0 }
 0x5ce   :  { %1591 = vmax.xlane.f32.xlu1 %v1590_v39  ;;  %v1801_v5 = vsel %vm688_vm3, %v1656_v34, 0 }
 0x5d0   :  { %v1523_v40 = vpop.f32.mrb[68].mxu1 }
 0x5d1   :  { %v1579_v31 = vmul.f32 0.35355338, %v1523_v40  ;;  %v4655_v41 = vpop.f32.mrb[69].mxu1 }
 0x5d2   :  { %v1526_v42 = vpop.f32.mrb[70].mxu1  ;;  %v1569_v43 = vpop.f32.mrb[80].mxu0 }
 0x5d3   :  { %v1580_v44 = vmul.f32 0.35355338, %v1569_v43  ;;  %v4656_v45 = vpop.f32.mrb[71].mxu1  ;;  %v4661_v46 = vpop.f32.mrb[81].mxu0  ;;  %v1593_v47 = vsel %vm324_vm2, %v1579_v31, -inf  ;;  %v1658_v43 = vpack.c.bf16 %v5573_v16, %v5573_v16 }
 0x5d4   :  { %1594 = vmax.xlane.f32.xlu0 %v1593_v47  ;;  %v1572_v48 = vpop.f32.mrb[82].mxu0 }
 0x5d5   :  { %v4662_v49 = vpop.f32.mrb[83].mxu0  ;;  %v1596_v50 = vsel %vm324_vm2, %v1580_v44, -inf }
 0x5d6   :  { %1597 = vmax.xlane.f32.xlu1 %v1596_v50 }
 0x651   :  { %v1583_v51 = vpop.xlane.xlu0 %1582 }
 0x652   :  { %v1599_v52 = vsub.f32 %v1575_v30, %v1583_v51 }
 0x653   :  { %v1586_v53 = vpop.xlane.xlu1 %1585 }
 0x654   :  { %v1605_v54 = vmul.f32 1.442695, %v1599_v52  ;;  %v1600_v55 = vsub.f32 %v1576_v18, %v1586_v53  ;;  %v4169_v53 = vld [vmem:[%s6121_s7 + $0x4] sm:$0xf] }
 0x656   :  { %5080 = vpow2.f32 %v1605_v54  ;;  %v1607_v11 = vmul.f32 1.442695, %v1600_v55  ;;  %v1950_v54 = vsel %vm688_vm3, %v4169_v53, 0  ;;  %v5046_v55 = vld [vmem:[%s6115_s1 + $0x20] sm:$0xff]  }
 0x658   :  { %5082 = vpow2.f32 %v1607_v11  ;;  %v5047_v11 = vld [vmem:[%s6115_s1 + $0x28] sm:$0xff]  }
 0x659   :  { %v1589_v56 = vpop.xlane.xlu0 %1588 }
 0x65a   :  { %v1601_v58 = vsub.f32 %v1577_v27, %v1589_v56  ;;  %v5048_v56 = vld [vmem:[%s6117_s3 + $0x20] sm:$0xff]  }
 0x65b   :  { %v1592_v57 = vpop.xlane.xlu1 %1591 }
 0x65c   :  { %v1609_v60 = vmul.f32 1.442695, %v1601_v58  ;;  %v1602_v61 = vsub.f32 %v1578_v33, %v1592_v57  ;;  %v5049_v58 = vld [vmem:[%s6117_s3 + $0x28] sm:$0xff]  }
 0x65e   :  { %5084 = vpow2.f32 %v1609_v60  ;;  %v1611_v63 = vmul.f32 1.442695, %v1602_v61 }
 0x660   :  { %v5081_v2 = vpop.eup %5080  ;;  %5086 = vpow2.f32 %v1611_v63 }
 0x661   :  { %v1595_v62 = vpop.xlane.xlu0 %1594  ;;  %v1617_v59 = vsel %vm324_vm2, %v5081_v2, 0.0 }
 0x662   :  { %v5083_v4 = vpop.eup %5082  ;;  %v1603_v24 = vsub.f32 %v1579_v31, %v1595_v62  ;;  %1618 = vadd.xlane.f32.xlu0 %v1617_v59  ;;  %v1657_v31 = vpack.c.bf16 %v5570_v12, %v5570_v12  ;;  %v1893_v12 = vsel %vm688_vm3, %v1658_v43, 0 }
 0x663   :  { %v1598_v0 = vpop.xlane.xlu1 %1597  ;;  %v1620_v3 = vsel %vm324_vm2, %v5083_v4, 0.0 }
 0x664   :  { %v1613_v6 = vmul.f32 1.442695, %v1603_v24  ;;  %v1604_v19 = vsub.f32 %v1580_v44, %v1598_v0  ;;  %1621 = vadd.xlane.f32.xlu1 %v1620_v3  ;;  %v1847_v46 = vsel %vm688_vm3, %v1657_v31, 0  ;;  %v5045_v3 = vld [vmem:[%s6116_s2 + $0x28] sm:$0xff]  }
 0x666   :  { %5088 = vpow2.f32 %v1613_v6  ;;  %v1615_v30 = vmul.f32 1.442695, %v1604_v19 }
 0x668   :  { %v5085_v9 = vpop.eup %5084  ;;  %5090 = vpow2.f32 %v1615_v30 }
 0x669   :  { %v1623_v14 = vsel %vm324_vm2, %v5085_v9, 0.0 }
 0x66a   :  { %v5087_v15 = vpop.eup %5086  ;;  %1624 = vadd.xlane.f32.xlu0 %v1623_v14 }
 0x66b   :  { %v1626_v18 = vsel %vm324_vm2, %v5087_v15, 0.0 }
 0x66c   :  { %1627 = vadd.xlane.f32.xlu1 %v1626_v18 }
 0x670   :  { %v5089_v20 = vpop.eup %5088 }
 0x671   :  { %v1629_v21 = vsel %vm324_vm2, %v5089_v20, 0.0 }
 0x672   :  { %v5091_v22 = vpop.eup %5090  ;;  %1630 = vadd.xlane.f32.xlu0 %v1629_v21 }
 0x673   :  { %v1632_v23 = vsel %vm324_vm2, %v5091_v22, 0.0 }
 0x674   :  { %1633 = vadd.xlane.f32.xlu1 %v1632_v23 }
 0x6ef   :  { %v1619_v25 = vpop.xlane.xlu0 %1618 }
 0x6f0   :  { %5092 = vrcp.f32 %v1619_v25 }
 0x6f1   :  { %v1622_v17 = vpop.xlane.xlu1 %1621 }
 0x6f2   :  { %5094 = vrcp.f32 %v1622_v17 }
 0x6f7   :  { %v1625_v26 = vpop.xlane.xlu0 %1624 }
 0x6f8   :  { %5096 = vrcp.f32 %v1625_v26 }
 0x6f9   :  { %v1628_v27 = vpop.xlane.xlu1 %1627 }
 0x6fa   :  { %v5093_v29 = vpop.eup %5092  ;;  %5098 = vrcp.f32 %v1628_v27 }
 0x6fb   :  { %v1641_v28 = vmul.f32 %v5093_v29, %v5081_v2  ;;  %v5044_v2 = vld [vmem:[%s6116_s2 + $0x20] sm:$0xff]  }
 0x6fc   :  { %v5095_v33 = vpop.eup %5094 }
 0x6fd   :  { %v1642_v35 = vmul.f32 %v5095_v33, %v5083_v4  ;;  %v1647_v36 = vpack.c.bf16 %v1641_v28, %v1641_v28 }
 0x6ff   :  { %v1631_v38 = vpop.xlane.xlu0 %1630  ;;  %4666 = vmatmul.mubr.msk.bf16.vlgmr.msra.gmra.mrb[72].mxu1 %vm324_vm2, %v1647_v36  ;;  %v1648_v39 = vpack.c.bf16 %v1642_v35, %v1642_v35 }
 0x700   :  { %5100 = vrcp.f32 %v1631_v38  ;;  %4676 = vmatpush3.bf16.msra.mxu1 %v1755_v37  ;;  %4677 = vmatprep.mubr.msk.bf16.mxu1 %vm5195_vm0, %v5194_v1 }
 0x701   :  { %4672 = vmatmul.mubr.msk.bf16.vlgmr.msra.gmra.mrb[84].mxu0 %vm324_vm2, %v1648_v39  ;;  %v1634_v40 = vpop.xlane.xlu1 %1633  ;;  %4687 = vmatprep.subr.bf16.mxu1 %v5194_v1 }
 0x702   :  { %v5097_v7 = vpop.eup %5096  ;;  %4682 = vmatpush3.bf16.msra.mxu0 %v1801_v5  ;;  %5102 = vrcp.f32 %v1634_v40  ;;  %4683 = vmatprep.mubr.msk.bf16.mxu0 %vm5195_vm0, %v5194_v1 }
 0x703   :  { %v1643_v41 = vmul.f32 %v5097_v7, %v5085_v9  ;;  %4693 = vmatprep.subr.bf16.mxu0 %v5194_v1 }
 0x704   :  { %v5099_v42 = vpop.eup %5098 }
 0x705   :  { %v1644_v44 = vmul.f32 %v5099_v42, %v5087_v15  ;;  %v1649_v45 = vpack.c.bf16 %v1643_v41, %v1643_v41 }
 0x707   :  { %4678 = vmatmul.mubr.msk.bf16.vlgmr.msra.gmra.mrb[76].mxu1 %vm324_vm2, %v1649_v45  ;;  %v1650_v47 = vpack.c.bf16 %v1644_v44, %v1644_v44 }
 0x708   :  { %4688 = vmatpush3.bf16.msra.mxu1 %v1847_v46  ;;  %4689 = vmatprep.mubr.msk.bf16.mxu1 %vm5195_vm0, %v5194_v1  ;;  %v5752_v46 = vld [vmem:[%s6120_s6 + $0x2] ss:$0 sm:$0xff] }
 0x709   :  { %4684 = vmatmul.mubr.msk.bf16.vlgmr.msra.gmra.mrb[88].mxu0 %vm324_vm2, %v1650_v47  ;;  %4699 = vmatprep.subr.bf16.mxu1 %v5194_v1 }
 0x70a   :  { %v5101_v48 = vpop.eup %5100  ;;  %4694 = vmatpush3.bf16.msra.mxu0 %v1893_v12  ;;  %4695 = vmatprep.mubr.msk.bf16.mxu0 %vm5195_vm0, %v5194_v1 }
 0x70b   :  { %v1645_v16 = vmul.f32 %v5101_v48, %v5089_v20  ;;  %4713 = vmatprep.subr.bf16.mxu0 %v5194_v1 }
 0x70c   :  { %v5103_v49 = vpop.eup %5102 }
 0x70d   :  { %v1646_v50 = vmul.f32 %v5103_v49, %v5091_v22  ;;  %v1651_v51 = vpack.c.bf16 %v1645_v16, %v1645_v16 }
 0x70f   :  { %4690 = vmatmul.mubr.msk.bf16.vlgmr.msra.gmra.mrb[80].mxu1 %vm324_vm2, %v1651_v51  ;;  %v1652_v52 = vpack.c.bf16 %v1646_v50, %v1646_v50 }
 0x710   :  { %4701 = vmatprep.mubr.msk.bf16.mxu1 %vm5195_vm0, %v5194_v1  ;;  %4700 = vmatpush3.bf16.msra.mxu1 %v1950_v54 }
 0x711   :  { %4696 = vmatmul.mubr.msk.bf16.vlgmr.msra.gmra.mrb[92].mxu0 %vm324_vm2, %v1652_v52  ;;  %4729 = vmatprep.subr.bf16.mxu1 %v5194_v1 }
 0x712   :  { %4717 = vmatprep.mubr.msk.bf16.mxu0 %vm5195_vm0, %v5194_v1  ;;  %4714 = vmatpush3.bf16.msra.mxu0 %v5046_v55 }
 0x713   :  { %4715 = vmatprep.subr.bf16.mxu0 %v5194_v1 }
 0x716   :  { %4716 = vmatpush3.bf16.msra.mxu0 %v5047_v11 }
 0x717   :  { %4745 = vmatprep.subr.bf16.mxu0 %v5194_v1 }
 0x719   :  { %4718 = vmatmul.mubr.msk.bf16.vlgmr.msra.gmra.mrb[96].mxu0 %vm85_vm1, %v5288_v8 }
 0x71a   :  { %4721 = vmatprep.mubr.msk.bf16.mxu0 %vm5195_vm0, %v5194_v1  ;;  %4746 = vmatpush3.bf16.msra.mxu0 %v5048_v56  ;;  %v4189_v56 = vld [vmem:[%s6119_s5 + $0x2] ss:$0 sm:$0xff] }
 0x71b   :  { %4747 = vmatprep.subr.bf16.mxu0 %v5194_v1 }
 0x71e   :  { %4748 = vmatpush3.bf16.msra.mxu0 %v5049_v58 }
 0x71f   :  { %4767 = vmatprep.subr.bf16.mxu0 %v5194_v1 }
 0x721   :  { %4722 = vmatmul.mubr.msk.bf16.gmra.mrb[100].mxu0 %vm85_vm1, %v5293_v10 }
 0x722   :  { %4725 = vmatprep.mubr.msk.bf16.mxu0 %vm5195_vm0, %v5194_v1 }
 0x729   :  { %4726 = vmatmul.mubr.msk.bf16.gmra.mrb[104].mxu0 %vm85_vm1, %v5312_v13 }
 0x72a   :  { %4749 = vmatprep.mubr.msk.bf16.mxu0 %vm5195_vm0, %v5194_v1 }
 0x731   :  { %4750 = vmatmul.mubr.msk.bf16.vlgmr.msra.gmra.mrb[108].mxu0 %vm85_vm1, %v5288_v8 }
 0x732   :  { %4753 = vmatprep.mubr.msk.bf16.mxu0 %vm5195_vm0, %v5194_v1 }
 0x739   :  { %4754 = vmatmul.mubr.msk.bf16.gmra.mrb[112].mxu0 %vm85_vm1, %v5293_v10 }
 0x73a   :  { %4757 = vmatprep.mubr.msk.bf16.mxu0 %vm5195_vm0, %v5194_v1 }
 0x741   :  { %4758 = vmatmul.mubr.msk.bf16.gmra.mrb[116].mxu0 %vm85_vm1, %v5312_v13 }
 0x742   :  { %4769 = vmatprep.mubr.msk.bf16.mxu0 %vm5195_vm0, %v5194_v1 }
 0x7d2   :  { %v1699_v57 = vpop.f32.mrb[72].mxu1 }
 0x7d3   :  { %v4667_v60 = vpop.f32.mrb[73].mxu1 }
 0x7d4   :  { %v1702_v61 = vpop.f32.mrb[74].mxu1  ;;  %v1745_v63 = vpop.f32.mrb[84].mxu0 }
 0x7d5   :  { %v1935_v62 = vpack.c.bf16 %v1745_v63, %v1699_v57  ;;  %v4668_v59 = vpop.f32.mrb[75].mxu1  ;;  %v4673_v4 = vpop.f32.mrb[85].mxu0  ;;  %v4178_v63 = vld [vmem:[%s6118_s4 + $0x2] ss:$0 sm:$0xff] }
 0x7d6   :  { %v1748_v24 = vpop.f32.mrb[86].mxu0 }
 0x7d7   :  { %v4674_v0 = vpop.f32.mrb[87].mxu0  ;;  %4702 = vmatmul.mubr.msk.bf16.vlgmr.msra.gmra.mrb[36].mxu1 %vm324_vm2, %v1935_v62 }
 0x7d8   :  { %4705 = vmatprep.mubr.msk.bf16.mxu1 %vm5195_vm0, %v5194_v1  ;;  %4730 = vmatpush3.bf16.msra.mxu1 %v5044_v2 }
 0x7d9   :  { %4731 = vmatprep.subr.bf16.mxu1 %v5194_v1 }
 0x7da   :  { %v1791_v6 = vpop.f32.mrb[76].mxu1 }
 0x7db   :  { %v4679_v19 = vpop.f32.mrb[77].mxu1 }
 0x7dc   :  { %v1794_v30 = vpop.f32.mrb[78].mxu1  ;;  %v1837_v9 = vpop.f32.mrb[88].mxu0  ;;  %4732 = vmatpush3.bf16.msra.mxu1 %v5045_v3 }
 0x7dd   :  { %v1936_v14 = vpack.c.bf16 %v1837_v9, %v1791_v6  ;;  %v4680_v15 = vpop.f32.mrb[79].mxu1  ;;  %v4685_v18 = vpop.f32.mrb[89].mxu0  ;;  %4761 = vmatprep.subr.bf16.mxu1 %v5194_v1 }
 0x7de   :  { %v1840_v20 = vpop.f32.mrb[90].mxu0 }
 0x7df   :  { %v4686_v21 = vpop.f32.mrb[91].mxu0  ;;  %4706 = vmatmul.mubr.msk.bf16.gmra.mrb[40].mxu1 %vm324_vm2, %v1936_v14 }
 0x7e0   :  { %4709 = vmatprep.mubr.msk.bf16.mxu1 %vm5195_vm0, %v5194_v1 }
 0x7e2   :  { %v1883_v22 = vpop.f32.mrb[80].mxu1 }
 0x7e3   :  { %v4691_v23 = vpop.f32.mrb[81].mxu1 }
 0x7e4   :  { %v1886_v25 = vpop.f32.mrb[82].mxu1  ;;  %v1929_v17 = vpop.f32.mrb[92].mxu0 }
 0x7e5   :  { %v1937_v26 = vpack.c.bf16 %v1929_v17, %v1883_v22  ;;  %v4692_v27 = vpop.f32.mrb[83].mxu1  ;;  %v4697_v29 = vpop.f32.mrb[93].mxu0 }
 0x7e6   :  { %v1932_v32 = vpop.f32.mrb[94].mxu0 }
 0x7e7   :  { %v4698_v28 = vpop.f32.mrb[95].mxu0  ;;  %4710 = vmatmul.mubr.msk.bf16.gmra.mrb[44].mxu1 %vm324_vm2, %v1937_v26 }
 0x7e8   :  { %4733 = vmatprep.mubr.msk.bf16.mxu1 %vm5195_vm0, %v5194_v1 }
 0x7ec   :  { %v2074_v33 = vpop.f32.mrb[96].mxu0 }
 0x7ed   :  { %v4719_v34 = vpop.f32.mrb[97].mxu0  ;;  %v2075_v0 = vadd.f32 %v4178_v63, %v2074_v33 }
 0x7ee   :  { %v2077_v35 = vpop.f32.mrb[98].mxu0 }
 0x7ef   :  { %4734 = vmatmul.mubr.msk.bf16.vlgmr.msra.gmra.mrb[84].mxu1 %vm85_vm1, %v5288_v8  ;;  %v4720_v36 = vpop.f32.mrb[99].mxu0  ;;  %v2261_v19 = vpack.c.bf16 %v2075_v0, %v2075_v0  ;;  %v2078_v30 = vadd.f32 %v4178_v63, %v2077_v35 }
 0x7f0   :  { %4737 = vmatprep.mubr.msk.bf16.mxu1 %vm5195_vm0, %v5194_v1 }
 0x7f1   :  { %v2262_v22 = vpack.c.bf16 %v2078_v30, %v2078_v30 }
 0x7f4   :  { %v2082_v37 = vpop.f32.mrb[100].mxu0 }
 0x7f5   :  { %v4723_v38 = vpop.f32.mrb[101].mxu0  ;;  %v2083_v17 = vadd.f32 %v4178_v63, %v2082_v37 }
 0x7f6   :  { %v2085_v39 = vpop.f32.mrb[102].mxu0 }
 0x7f7   :  { %4738 = vmatmul.mubr.msk.bf16.gmra.mrb[88].mxu1 %vm85_vm1, %v5293_v10  ;;  %v4724_v5 = vpop.f32.mrb[103].mxu0  ;;  %v2086_v27 = vadd.f32 %v4178_v63, %v2085_v39  ;;  %v2263_v32 = vpack.c.bf16 %v2083_v17, %v2083_v17 }
 0x7f8   :  { %4741 = vmatprep.mubr.msk.bf16.mxu1 %vm5195_vm0, %v5194_v1 }
 0x7f9   :  { %v2264_v5 = vpack.c.bf16 %v2086_v27, %v2086_v27 }
 0x7fc   :  { %v5741_v40 = vpop.f32.mrb[104].mxu0 }
 0x7fd   :  { %v4727_v7 = vpop.f32.mrb[105].mxu0 }
 0x7fe   :  { %v5743_v31 = vpop.f32.mrb[106].mxu0 }
 0x7ff   :  { %4742 = vmatmul.mubr.msk.bf16.gmra.mrb[92].mxu1 %vm85_vm1, %v5312_v13  ;;  %v4728_v41 = vpop.f32.mrb[107].mxu0 }
 0x800   :  { %4763 = vmatprep.mubr.msk.bf16.mxu1 %vm5195_vm0, %v5194_v1  ;;  %v2091_v41 = vadd.f32 %v4178_v63, %v5741_v40 }
 0x802   :  { %v2265_v40 = vpack.c.bf16 %v2091_v41, %v2091_v41 }
 0x804   :  { %v5745_v42 = vpop.f32.mrb[108].mxu0 }
 0x805   :  { %v4751_v43 = vpop.f32.mrb[109].mxu0  ;;  %v2239_v38 = vadd.f32 %v5752_v46, %v5745_v42 }
 0x806   :  { %v5747_v44 = vpop.f32.mrb[110].mxu0 }
 0x807   :  { %v4752_v45 = vpop.f32.mrb[111].mxu0  ;;  %v2242_v43 = vadd.f32 %v5752_v46, %v5747_v44  ;;  %v2627_v42 = vpack.c.bf16 %v2239_v38, %v2239_v38 }
 0x809   :  { %v2637_v44 = vsel %vm688_vm3, %v2627_v42, 0 }
 0x80c   :  { %v2246_v47 = vpop.f32.mrb[112].mxu0 }
 0x80d   :  { %v5755_v12 = vadd.f32 %v5752_v46, %v2246_v47  ;;  %v4755_v48 = vpop.f32.mrb[113].mxu0  ;;  %v2094_v47 = vadd.f32 %v4178_v63, %v5743_v31 }
 0x80e   :  { %v2249_v16 = vpop.f32.mrb[114].mxu0  ;;  %v2628_v48 = vpack.c.bf16 %v2242_v43, %v2242_v43 }
 0x80f   :  { %v5758_v49 = vadd.f32 %v5752_v46, %v2249_v16  ;;  %v4756_v50 = vpop.f32.mrb[115].mxu0 }
 0x810   :  { %v2683_v16 = vsel %vm688_vm3, %v2628_v48, 0 }
 0x814   :  { %v2254_v51 = vpop.f32.mrb[116].mxu0 }
 0x815   :  { %v5761_v52 = vadd.f32 %v5752_v46, %v2254_v51  ;;  %v4759_v53 = vpop.f32.mrb[117].mxu0 }
 0x816   :  { %v2257_v54 = vpop.f32.mrb[118].mxu0 }
 0x817   :  { %v5764_v55 = vadd.f32 %v5752_v46, %v2257_v54  ;;  %v4760_v11 = vpop.f32.mrb[119].mxu0  ;;  %v2266_v46 = vpack.c.bf16 %v2094_v47, %v2094_v47 }
 0x8c2   :  { %v2156_v58 = vpop.f32.mrb[84].mxu1 }
 0x8c3   :  { %v2157_v57 = vadd.f32 %v4189_v56, %v2156_v58  ;;  %v4735_v60 = vpop.f32.mrb[85].mxu1 }
 0x8c4   :  { %v2159_v61 = vpop.f32.mrb[86].mxu1 }
 0x8c5   :  { %v2267_v2 = vpack.c.bf16 %v2157_v57, %v2157_v57  ;;  %v2160_v62 = vadd.f32 %v4189_v56, %v2159_v61  ;;  %v4736_v59 = vpop.f32.mrb[87].mxu1 }
 0x8c7   :  { %v2277_v4 = vsel %vm324_vm2, %v2267_v2, 0  ;;  %v2268_v24 = vpack.c.bf16 %v2160_v62, %v2160_v62 }
 0x8c8   :  { %4762 = vmatpush3.bf16.xpose.msra.mxu1 %v2277_v4 }
 0x8c9   :  { %v2323_v3 = vsel %vm324_vm2, %v2268_v24, 0  ;;  %4773 = vmatprep.subr.bf16.mxu1 %v5194_v1 }
 0x8ca   :  { %v2164_v6 = vpop.f32.mrb[88].mxu1  ;;  %4768 = vmatpush3.bf16.xpose.msra.mxu0 %v2323_v3 }
 0x8cb   :  { %v2165_v9 = vadd.f32 %v4189_v56, %v2164_v6  ;;  %v4739_v14 = vpop.f32.mrb[89].mxu1  ;;  %4779 = vmatprep.subr.bf16.mxu0 %v5194_v1 }
 0x8cc   :  { %v2167_v15 = vpop.f32.mrb[90].mxu1 }
 0x8cd   :  { %v2269_v18 = vpack.c.bf16 %v2165_v9, %v2165_v9  ;;  %v2168_v20 = vadd.f32 %v4189_v56, %v2167_v15  ;;  %v4740_v21 = vpop.f32.mrb[91].mxu1 }
 0x8cf   :  { %v2369_v23 = vsel %vm324_vm2, %v2269_v18, 0  ;;  %v2270_v25 = vpack.c.bf16 %v2168_v20, %v2168_v20  ;;  %4764 = vmatmul.mubr.msk.bf16.vlgmr.msra.gmra.mrb[96].mxu1 %vm324_vm2, %v2261_v19 }
 0x8d0   :  { %4774 = vmatpush3.bf16.xpose.msra.mxu1 %v2369_v23  ;;  %4775 = vmatprep.mubr.msk.bf16.mxu1 %vm5195_vm0, %v5194_v1 }
 0x8d1   :  { %v2415_v26 = vsel %vm324_vm2, %v2270_v25, 0  ;;  %4770 = vmatmul.mubr.msk.bf16.vlgmr.msra.gmra.mrb[120].mxu0 %vm324_vm2, %v2262_v22  ;;  %4785 = vmatprep.subr.bf16.mxu1 %v5194_v1 }
 0x8d2   :  { %v2172_v29 = vpop.f32.mrb[92].mxu1  ;;  %4780 = vmatpush3.bf16.xpose.msra.mxu0 %v2415_v26  ;;  %4781 = vmatprep.mubr.msk.bf16.mxu0 %vm5195_vm0, %v5194_v1 }
 0x8d3   :  { %v2173_v28 = vadd.f32 %v4189_v56, %v2172_v29  ;;  %v4743_v33 = vpop.f32.mrb[93].mxu1  ;;  %4791 = vmatprep.subr.bf16.mxu0 %v5194_v1 }
 0x8d4   :  { %v2175_v34 = vpop.f32.mrb[94].mxu1 }
 0x8d5   :  { %v2271_v35 = vpack.c.bf16 %v2173_v28, %v2173_v28  ;;  %v2176_v36 = vadd.f32 %v4189_v56, %v2175_v34  ;;  %v4744_v37 = vpop.f32.mrb[95].mxu1 }
 0x8d7   :  { %v2461_v39 = vsel %vm324_vm2, %v2271_v35, 0  ;;  %v2272_v7 = vpack.c.bf16 %v2176_v36, %v2176_v36  ;;  %4776 = vmatmul.mubr.msk.bf16.vlgmr.msra.gmra.mrb[100].mxu1 %vm324_vm2, %v2263_v32 }
 0x8d8   :  { %4786 = vmatpush3.bf16.xpose.msra.mxu1 %v2461_v39  ;;  %4787 = vmatprep.mubr.msk.bf16.mxu1 %vm5195_vm0, %v5194_v1 }
 0x8d9   :  { %v2507_v45 = vsel %vm324_vm2, %v2272_v7, 0  ;;  %4782 = vmatmul.mubr.msk.bf16.vlgmr.msra.gmra.mrb[124].mxu0 %vm324_vm2, %v2264_v5  ;;  %4797 = vmatprep.subr.bf16.mxu1 %v5194_v1 }
 0x8da   :  { %4792 = vmatpush3.bf16.xpose.msra.mxu0 %v2507_v45  ;;  %4793 = vmatprep.mubr.msk.bf16.mxu0 %vm5195_vm0, %v5194_v1 }
 0x8db   :  { %4803 = vmatprep.subr.bf16.mxu0 %v5194_v1 }
 0x8df   :  { %4788 = vmatmul.mubr.msk.bf16.vlgmr.msra.gmra.mrb[104].mxu1 %vm324_vm2, %v2265_v40 }
 0x8e0   :  { %4798 = vmatpush3.bf16.msra.mxu1 %v2637_v44  ;;  %4799 = vmatprep.mubr.msk.bf16.mxu1 %vm5195_vm0, %v5194_v1 }
 0x8e1   :  { %4794 = vmatmul.mubr.msk.bf16.vlgmr.msra.gmra.mrb[128].mxu0 %vm324_vm2, %v2266_v46  ;;  %4809 = vmatprep.subr.bf16.mxu1 %v5194_v1 }
 0x8e2   :  { %4804 = vmatpush3.bf16.msra.mxu0 %v2683_v16  ;;  %4805 = vmatprep.mubr.msk.bf16.mxu0 %vm5195_vm0, %v5194_v1 }
 0x8e3   :  { %4815 = vmatprep.subr.bf16.mxu0 %v5194_v1 }
 0x9a2   :  { %v2313_v31 = vpop.f32.mrb[96].mxu1 }
 0x9a3   :  { %v2549_v50 = vmul.f32 0.35355338, %v2313_v31  ;;  %v4765_v51 = vpop.f32.mrb[97].mxu1 }
 0x9a4   :  { %v2316_v53 = vpop.f32.mrb[98].mxu1  ;;  %v2359_v54 = vpop.f32.mrb[120].mxu0 }
 0x9a5   :  { %v2550_v11 = vmul.f32 0.35355338, %v2359_v54  ;;  %v4766_v56 = vpop.f32.mrb[99].mxu1  ;;  %v4771_v58 = vpop.f32.mrb[121].mxu0  ;;  %v2555_v57 = vsel %vm324_vm2, %v2549_v50, -inf }
 0x9a6   :  { %2556 = vmax.xlane.f32.xlu0 %v2555_v57  ;;  %v2362_v60 = vpop.f32.mrb[122].mxu0 }
 0x9a7   :  { %v4772_v61 = vpop.f32.mrb[123].mxu0  ;;  %v2558_v63 = vsel %vm324_vm2, %v2550_v11, -inf }
 0x9a8   :  { %2559 = vmax.xlane.f32.xlu1 %v2558_v63 }
 0x9aa   :  { %v2405_v2 = vpop.f32.mrb[100].mxu1 }
 0x9ab   :  { %v2551_v62 = vmul.f32 0.35355338, %v2405_v2  ;;  %v4777_v59 = vpop.f32.mrb[101].mxu1 }
 0x9ac   :  { %v2408_v4 = vpop.f32.mrb[102].mxu1  ;;  %v2451_v24 = vpop.f32.mrb[124].mxu0 }
 0x9ad   :  { %v2552_v0 = vmul.f32 0.35355338, %v2451_v24  ;;  %v4778_v3 = vpop.f32.mrb[103].mxu1  ;;  %v4783_v6 = vpop.f32.mrb[125].mxu0  ;;  %v2561_v19 = vsel %vm324_vm2, %v2551_v62, -inf  ;;  %v2629_v4 = vpack.c.bf16 %v5755_v12, %v5755_v12 }
 0x9ae   :  { %2562 = vmax.xlane.f32.xlu0 %v2561_v19  ;;  %v2454_v30 = vpop.f32.mrb[126].mxu0  ;;  %v2630_v3 = vpack.c.bf16 %v5758_v49, %v5758_v49 }
 0x9af   :  { %v4784_v9 = vpop.f32.mrb[127].mxu0  ;;  %v2564_v14 = vsel %vm324_vm2, %v2552_v0, -inf  ;;  %v2729_v30 = vsel %vm688_vm3, %v2629_v4, 0 }
 0x9b0   :  { %2565 = vmax.xlane.f32.xlu1 %v2564_v14  ;;  %v2775_v12 = vsel %vm688_vm3, %v2630_v3, 0 }
 0x9b2   :  { %v2497_v15 = vpop.f32.mrb[104].mxu1 }
 0x9b3   :  { %v2553_v18 = vmul.f32 0.35355338, %v2497_v15  ;;  %v4789_v20 = vpop.f32.mrb[105].mxu1 }
 0x9b4   :  { %v2500_v21 = vpop.f32.mrb[106].mxu1  ;;  %v2543_v22 = vpop.f32.mrb[128].mxu0 }
 0x9b5   :  { %v2554_v23 = vmul.f32 0.35355338, %v2543_v22  ;;  %v4790_v25 = vpop.f32.mrb[107].mxu1  ;;  %v4795_v17 = vpop.f32.mrb[129].mxu0  ;;  %v2567_v26 = vsel %vm324_vm2, %v2553_v18, -inf  ;;  %v2632_v22 = vpack.c.bf16 %v5764_v55, %v5764_v55 }
 0x9b6   :  { %2568 = vmax.xlane.f32.xlu0 %v2567_v26  ;;  %v2546_v27 = vpop.f32.mrb[130].mxu0 }
 0x9b7   :  { %v4796_v29 = vpop.f32.mrb[131].mxu0  ;;  %v2570_v32 = vsel %vm324_vm2, %v2554_v23, -inf }
 0x9b8   :  { %2571 = vmax.xlane.f32.xlu1 %v2570_v32 }
 0xa33   :  { %v2557_v28 = vpop.xlane.xlu0 %2556 }
 0xa34   :  { %v2573_v33 = vsub.f32 %v2549_v50, %v2557_v28 }
 0xa35   :  { %v2560_v34 = vpop.xlane.xlu1 %2559 }
 0xa36   :  { %v2579_v35 = vmul.f32 1.442695, %v2573_v33  ;;  %v2574_v36 = vsub.f32 %v2550_v11, %v2560_v34  ;;  %v4218_v34 = vld [vmem:[%s6121_s7 + $0x8] sm:$0xf] }
 0xa38   :  { %5104 = vpow2.f32 %v2579_v35  ;;  %v2581_v37 = vmul.f32 1.442695, %v2574_v36  ;;  %v2924_v35 = vsel %vm688_vm3, %v4218_v34, 0  ;;  %v5052_v36 = vld [vmem:[%s6115_s1 + $0x30] sm:$0xff]  }
 0xa3a   :  { %5106 = vpow2.f32 %v2581_v37  ;;  %v5053_v37 = vld [vmem:[%s6115_s1 + $0x38] sm:$0xff]  }
 0xa3b   :  { %v2563_v38 = vpop.xlane.xlu0 %2562 }
 0xa3c   :  { %v2575_v5 = vsub.f32 %v2551_v62, %v2563_v38  ;;  %v5054_v38 = vld [vmem:[%s6117_s3 + $0x30] sm:$0xff]  }
 0xa3d   :  { %v2566_v39 = vpop.xlane.xlu1 %2565 }
 0xa3e   :  { %v2583_v7 = vmul.f32 1.442695, %v2575_v5  ;;  %v2576_v41 = vsub.f32 %v2552_v0, %v2566_v39  ;;  %v5055_v5 = vld [vmem:[%s6117_s3 + $0x38] sm:$0xff]  }
 0xa40   :  { %5108 = vpow2.f32 %v2583_v7  ;;  %v2585_v43 = vmul.f32 1.442695, %v2576_v41 }
 0xa42   :  { %v5105_v45 = vpop.eup %5104  ;;  %5110 = vpow2.f32 %v2585_v43 }
 0xa43   :  { %v2569_v42 = vpop.xlane.xlu0 %2568  ;;  %v2591_v40 = vsel %vm324_vm2, %v5105_v45, 0.0 }
 0xa44   :  { %v5107_v47 = vpop.eup %5106  ;;  %v2577_v48 = vsub.f32 %v2553_v18, %v2569_v42  ;;  %2592 = vadd.xlane.f32.xlu0 %v2591_v40  ;;  %v2631_v18 = vpack.c.bf16 %v5761_v52, %v5761_v52  ;;  %v2867_v52 = vsel %vm688_vm3, %v2632_v22, 0  ;;  %v5943_v22 = vld [vmem:[%s6120_s6 + $0x3] ss:$0 sm:$0xff] }
 0xa45   :  { %v2572_v44 = vpop.xlane.xlu1 %2571  ;;  %v2594_v46 = vsel %vm324_vm2, %v5107_v47, 0.0 }
 0xa46   :  { %v2587_v16 = vmul.f32 1.442695, %v2577_v48  ;;  %v2578_v31 = vsub.f32 %v2554_v23, %v2572_v44  ;;  %2595 = vadd.xlane.f32.xlu1 %v2594_v46  ;;  %v2821_v17 = vsel %vm688_vm3, %v2631_v18, 0  ;;  %v5051_v46 = vld [vmem:[%s6116_s2 + $0x38] sm:$0xff]  }
 0xa48   :  { %5112 = vpow2.f32 %v2587_v16  ;;  %v2589_v50 = vmul.f32 1.442695, %v2578_v31 }
 0xa4a   :  { %v5109_v51 = vpop.eup %5108  ;;  %5114 = vpow2.f32 %v2589_v50 }
 0xa4b   :  { %v2597_v53 = vsel %vm324_vm2, %v5109_v51, 0.0 }
 0xa4c   :  { %v5111_v54 = vpop.eup %5110  ;;  %2598 = vadd.xlane.f32.xlu0 %v2597_v53 }
 0xa4d   :  { %v2600_v11 = vsel %vm324_vm2, %v5111_v54, 0.0 }
 0xa4e   :  { %2601 = vadd.xlane.f32.xlu1 %v2600_v11 }
 0xa52   :  { %v5113_v56 = vpop.eup %5112 }
 0xa53   :  { %v2603_v58 = vsel %vm324_vm2, %v5113_v56, 0.0 }
 0xa54   :  { %v5115_v57 = vpop.eup %5114  ;;  %2604 = vadd.xlane.f32.xlu0 %v2603_v58 }
 0xa55   :  { %v2606_v60 = vsel %vm324_vm2, %v5115_v57, 0.0 }
 0xa56   :  { %2607 = vadd.xlane.f32.xlu1 %v2606_v60 }
 0xad1   :  { %v2593_v61 = vpop.xlane.xlu0 %2592 }
 0xad2   :  { %5116 = vrcp.f32 %v2593_v61 }
 0xad3   :  { %v2596_v63 = vpop.xlane.xlu1 %2595 }
 0xad4   :  { %5118 = vrcp.f32 %v2596_v63 }
 0xad9   :  { %v2599_v2 = vpop.xlane.xlu0 %2598 }
 0xada   :  { %5120 = vrcp.f32 %v2599_v2 }
 0xadb   :  { %v2602_v62 = vpop.xlane.xlu1 %2601 }
 0xadc   :  { %v5117_v59 = vpop.eup %5116  ;;  %5122 = vrcp.f32 %v2602_v62 }
 0xadd   :  { %v2615_v24 = vmul.f32 %v5117_v59, %v5105_v45  ;;  %v5050_v45 = vld [vmem:[%s6116_s2 + $0x30] sm:$0xff]  }
 0xade   :  { %v5119_v0 = vpop.eup %5118 }
 0xadf   :  { %v2616_v6 = vmul.f32 %v5119_v0, %v5107_v47  ;;  %v2621_v19 = vpack.c.bf16 %v2615_v24, %v2615_v24 }
 0xae1   :  { %v2605_v9 = vpop.xlane.xlu0 %2604  ;;  %4800 = vmatmul.mubr.msk.bf16.vlgmr.msra.gmra.mrb[108].mxu1 %vm324_vm2, %v2621_v19  ;;  %v2622_v14 = vpack.c.bf16 %v2616_v6, %v2616_v6 }
 0xae2   :  { %5124 = vrcp.f32 %v2605_v9  ;;  %4810 = vmatpush3.bf16.msra.mxu1 %v2729_v30  ;;  %4811 = vmatprep.mubr.msk.bf16.mxu1 %vm5195_vm0, %v5194_v1 }
 0xae3   :  { %4806 = vmatmul.mubr.msk.bf16.vlgmr.msra.gmra.mrb[132].mxu0 %vm324_vm2, %v2622_v14  ;;  %v2608_v15 = vpop.xlane.xlu1 %2607  ;;  %4821 = vmatprep.subr.bf16.mxu1 %v5194_v1 }
 0xae4   :  { %v5121_v49 = vpop.eup %5120  ;;  %4816 = vmatpush3.bf16.msra.mxu0 %v2775_v12  ;;  %5126 = vrcp.f32 %v2608_v15  ;;  %4817 = vmatprep.mubr.msk.bf16.mxu0 %vm5195_vm0, %v5194_v1 }
 0xae5   :  { %v2617_v20 = vmul.f32 %v5121_v49, %v5109_v51  ;;  %4827 = vmatprep.subr.bf16.mxu0 %v5194_v1 }
 0xae6   :  { %v5123_v21 = vpop.eup %5122 }
 0xae7   :  { %v2618_v23 = vmul.f32 %v5123_v21, %v5111_v54  ;;  %v2623_v25 = vpack.c.bf16 %v2617_v20, %v2617_v20 }
 0xae9   :  { %4812 = vmatmul.mubr.msk.bf16.vlgmr.msra.gmra.mrb[112].mxu1 %vm324_vm2, %v2623_v25  ;;  %v2624_v26 = vpack.c.bf16 %v2618_v23, %v2618_v23 }
 0xaea   :  { %4822 = vmatpush3.bf16.msra.mxu1 %v2821_v17  ;;  %4823 = vmatprep.mubr.msk.bf16.mxu1 %vm5195_vm0, %v5194_v1 }
 0xaeb   :  { %4818 = vmatmul.mubr.msk.bf16.vlgmr.msra.gmra.mrb[136].mxu0 %vm324_vm2, %v2624_v26  ;;  %4833 = vmatprep.subr.bf16.mxu1 %v5194_v1 }
 0xaec   :  { %v5125_v27 = vpop.eup %5124  ;;  %4828 = vmatpush3.bf16.msra.mxu0 %v2867_v52  ;;  %4829 = vmatprep.mubr.msk.bf16.mxu0 %vm5195_vm0, %v5194_v1 }
 0xaed   :  { %v2619_v55 = vmul.f32 %v5125_v27, %v5113_v56  ;;  %4847 = vmatprep.subr.bf16.mxu0 %v5194_v1 }
 0xaee   :  { %v5127_v29 = vpop.eup %5126 }
 0xaef   :  { %v2620_v32 = vmul.f32 %v5127_v29, %v5115_v57  ;;  %v2625_v28 = vpack.c.bf16 %v2619_v55, %v2619_v55 }
 0xaf1   :  { %4824 = vmatmul.mubr.msk.bf16.vlgmr.msra.gmra.mrb[116].mxu1 %vm324_vm2, %v2625_v28  ;;  %v2626_v33 = vpack.c.bf16 %v2620_v32, %v2620_v32 }
 0xaf2   :  { %4835 = vmatprep.mubr.msk.bf16.mxu1 %vm5195_vm0, %v5194_v1  ;;  %4834 = vmatpush3.bf16.msra.mxu1 %v2924_v35  ;;  %v4238_v35 = vld [vmem:[%s6119_s5 + $0x3] ss:$0 sm:$0xff] }
 0xaf3   :  { %4830 = vmatmul.mubr.msk.bf16.vlgmr.msra.gmra.mrb[140].mxu0 %vm324_vm2, %v2626_v33  ;;  %4863 = vmatprep.subr.bf16.mxu1 %v5194_v1 }
 0xaf4   :  { %4851 = vmatprep.mubr.msk.bf16.mxu0 %vm5195_vm0, %v5194_v1  ;;  %4848 = vmatpush3.bf16.msra.mxu0 %v5052_v36 }
 0xaf5   :  { %4849 = vmatprep.subr.bf16.mxu0 %v5194_v1 }
 0xaf8   :  { %4850 = vmatpush3.bf16.msra.mxu0 %v5053_v37 }
 0xaf9   :  { %4879 = vmatprep.subr.bf16.mxu0 %v5194_v1 }
 0xafb   :  { %4852 = vmatmul.mubr.msk.bf16.vlgmr.msra.gmra.mrb[144].mxu0 %vm85_vm1, %v5288_v8 }
 0xafc   :  { %4855 = vmatprep.mubr.msk.bf16.mxu0 %vm5195_vm0, %v5194_v1  ;;  %4880 = vmatpush3.bf16.msra.mxu0 %v5054_v38 }
 0xafd   :  { %4881 = vmatprep.subr.bf16.mxu0 %v5194_v1 }
 0xb00   :  { %4882 = vmatpush3.bf16.msra.mxu0 %v5055_v5 }
 0xb01   :  { %4901 = vmatprep.subr.bf16.mxu0 %v5194_v1 }
 0xb03   :  { %4856 = vmatmul.mubr.msk.bf16.gmra.mrb[148].mxu0 %vm85_vm1, %v5293_v10 }
 0xb04   :  { %4859 = vmatprep.mubr.msk.bf16.mxu0 %vm5195_vm0, %v5194_v1 }
 0xb0b   :  { %4860 = vmatmul.mubr.msk.bf16.gmra.mrb[152].mxu0 %vm85_vm1, %v5312_v13 }
 0xb0c   :  { %4883 = vmatprep.mubr.msk.bf16.mxu0 %vm5195_vm0, %v5194_v1 }
 0xb13   :  { %4884 = vmatmul.mubr.msk.bf16.vlgmr.msra.gmra.mrb[156].mxu0 %vm85_vm1, %v5288_v8 }
 0xb14   :  { %4887 = vmatprep.mubr.msk.bf16.mxu0 %vm5195_vm0, %v5194_v1 }
 0xb1b   :  { %4888 = vmatmul.mubr.msk.bf16.gmra.mrb[160].mxu0 %vm85_vm1, %v5293_v10 }
 0xb1c   :  { %4891 = vmatprep.mubr.msk.bf16.mxu0 %vm5195_vm0, %v5194_v1 }
 0xb23   :  { %4892 = vmatmul.mubr.msk.bf16.gmra.mrb[164].mxu0 %vm85_vm1, %v5312_v13 }
 0xb24   :  { %4903 = vmatprep.mubr.msk.bf16.mxu0 %vm5195_vm0, %v5194_v1 }
 0xbb4   :  { %v2673_v39 = vpop.f32.mrb[108].mxu1 }
 0xbb5   :  { %v4801_v7 = vpop.f32.mrb[109].mxu1 }
 0xbb6   :  { %v2676_v41 = vpop.f32.mrb[110].mxu1  ;;  %v2719_v43 = vpop.f32.mrb[132].mxu0 }
 0xbb7   :  { %v2909_v42 = vpack.c.bf16 %v2719_v43, %v2673_v39  ;;  %v4802_v40 = vpop.f32.mrb[111].mxu1  ;;  %v4807_v47 = vpop.f32.mrb[133].mxu0  ;;  %v4227_v39 = vld [vmem:[%s6118_s4 + $0x3] ss:$0 sm:$0xff] }
 0xbb8   :  { %v2722_v48 = vpop.f32.mrb[134].mxu0 }
 0xbb9   :  { %v4808_v44 = vpop.f32.mrb[135].mxu0  ;;  %4836 = vmatmul.mubr.msk.bf16.vlgmr.msra.gmra.mrb[36].mxu1 %vm324_vm2, %v2909_v42 }
 0xbba   :  { %4839 = vmatprep.mubr.msk.bf16.mxu1 %vm5195_vm0, %v5194_v1  ;;  %4864 = vmatpush3.bf16.msra.mxu1 %v5050_v45 }
 0xbbb   :  { %4865 = vmatprep.subr.bf16.mxu1 %v5194_v1 }
 0xbbc   :  { %v2765_v16 = vpop.f32.mrb[112].mxu1 }
 0xbbd   :  { %v4813_v31 = vpop.f32.mrb[113].mxu1 }
 0xbbe   :  { %v2768_v50 = vpop.f32.mrb[114].mxu1  ;;  %v2811_v51 = vpop.f32.mrb[136].mxu0  ;;  %4866 = vmatpush3.bf16.msra.mxu1 %v5051_v46 }
 0xbbf   :  { %v2910_v53 = vpack.c.bf16 %v2811_v51, %v2765_v16  ;;  %v4814_v54 = vpop.f32.mrb[115].mxu1  ;;  %v4819_v11 = vpop.f32.mrb[137].mxu0  ;;  %4895 = vmatprep.subr.bf16.mxu1 %v5194_v1 }
 0xbc0   :  { %v2814_v56 = vpop.f32.mrb[138].mxu0 }
 0xbc1   :  { %v4820_v58 = vpop.f32.mrb[139].mxu0  ;;  %4840 = vmatmul.mubr.msk.bf16.gmra.mrb[40].mxu1 %vm324_vm2, %v2910_v53 }
 0xbc2   :  { %4843 = vmatprep.mubr.msk.bf16.mxu1 %vm5195_vm0, %v5194_v1 }
 0xbc4   :  { %v2857_v57 = vpop.f32.mrb[116].mxu1 }
 0xbc5   :  { %v4825_v60 = vpop.f32.mrb[117].mxu1 }
 0xbc6   :  { %v2860_v61 = vpop.f32.mrb[118].mxu1  ;;  %v2903_v63 = vpop.f32.mrb[140].mxu0 }
 0xbc7   :  { %v2911_v2 = vpack.c.bf16 %v2903_v63, %v2857_v57  ;;  %v4826_v62 = vpop.f32.mrb[119].mxu1  ;;  %v4831_v59 = vpop.f32.mrb[141].mxu0 }
 0xbc8   :  { %v2906_v4 = vpop.f32.mrb[142].mxu0 }
 0xbc9   :  { %v4832_v24 = vpop.f32.mrb[143].mxu0  ;;  %4844 = vmatmul.mubr.msk.bf16.gmra.mrb[44].mxu1 %vm324_vm2, %v2911_v2 }
 0xbca   :  { %4867 = vmatprep.mubr.msk.bf16.mxu1 %vm5195_vm0, %v5194_v1 }
 0xbce   :  { %v3048_v0 = vpop.f32.mrb[144].mxu0 }
 0xbcf   :  { %v4853_v3 = vpop.f32.mrb[145].mxu0  ;;  %v3049_v40 = vadd.f32 %v4227_v39, %v3048_v0 }
 0xbd0   :  { %v3051_v6 = vpop.f32.mrb[146].mxu0 }
 0xbd1   :  { %4868 = vmatmul.mubr.msk.bf16.vlgmr.msra.gmra.mrb[120].mxu1 %vm85_vm1, %v5288_v8  ;;  %v4854_v19 = vpop.f32.mrb[147].mxu0  ;;  %v3235_v44 = vpack.c.bf16 %v3049_v40, %v3049_v40  ;;  %v3052_v31 = vadd.f32 %v4227_v39, %v3051_v6 }
 0xbd2   :  { %4871 = vmatprep.mubr.msk.bf16.mxu1 %vm5195_vm0, %v5194_v1 }
 0xbd3   :  { %v3236_v56 = vpack.c.bf16 %v3052_v31, %v3052_v31 }
 0xbd6   :  { %v3056_v8 = vpop.f32.mrb[148].mxu0 }
 0xbd7   :  { %v4857_v30 = vpop.f32.mrb[149].mxu0  ;;  %v3057_v57 = vadd.f32 %v4227_v39, %v3056_v8 }
 0xbd8   :  { %v3059_v9 = vpop.f32.mrb[150].mxu0 }
 0xbd9   :  { %4872 = vmatmul.mubr.msk.bf16.gmra.mrb[124].mxu1 %vm85_vm1, %v5293_v10  ;;  %v4858_v14 = vpop.f32.mrb[151].mxu0  ;;  %v3060_v63 = vadd.f32 %v4227_v39, %v3059_v9  ;;  %v3237_v2 = vpack.c.bf16 %v3057_v57, %v3057_v57 }
 0xbda   :  { %4875 = vmatprep.mubr.msk.bf16.mxu1 %vm5195_vm0, %v5194_v1 }
 0xbdb   :  { %v3238_v19 = vpack.c.bf16 %v3060_v63, %v3060_v63 }
 0xbde   :  { %v5932_v12 = vpop.f32.mrb[152].mxu0 }
 0xbdf   :  { %v4861_v10 = vpop.f32.mrb[153].mxu0  ;;  %v3065_v9 = vadd.f32 %v4227_v39, %v5932_v12 }
 0xbe0   :  { %v5934_v15 = vpop.f32.mrb[154].mxu0 }
 0xbe1   :  { %4876 = vmatmul.mubr.msk.bf16.gmra.mrb[128].mxu1 %vm85_vm1, %v5312_v13  ;;  %v4862_v49 = vpop.f32.mrb[155].mxu0  ;;  %v3068_v12 = vadd.f32 %v4227_v39, %v5934_v15 }
 0xbe2   :  { %4897 = vmatprep.mubr.msk.bf16.mxu1 %vm5195_vm0, %v5194_v1 }
 0xbe6   :  { %v5936_v18 = vpop.f32.mrb[156].mxu0 }
 0xbe7   :  { %v4885_v13 = vpop.f32.mrb[157].mxu0  ;;  %v3213_v6 = vadd.f32 %v5943_v22, %v5936_v18  ;;  %v3239_v18 = vpack.c.bf16 %v3065_v9, %v3065_v9 }
 0xbe8   :  { %v5938_v20 = vpop.f32.mrb[158].mxu0 }
 0xbe9   :  { %v4886_v21 = vpop.f32.mrb[159].mxu0  ;;  %v3216_v14 = vadd.f32 %v5943_v22, %v5938_v20  ;;  %v3601_v49 = vpack.c.bf16 %v3213_v6, %v3213_v6 }
 0xbea   :  { %v3240_v21 = vpack.c.bf16 %v3068_v12, %v3068_v12 }
 0xbeb   :  { %v3602_v13 = vpack.c.bf16 %v3216_v14, %v3216_v14  ;;  %v3611_v20 = vsel %vm688_vm3, %v3601_v49, 0 }
 0xbee   :  { %v3220_v23 = vpop.f32.mrb[160].mxu0 }
 0xbef   :  { %v5946_v25 = vadd.f32 %v5943_v22, %v3220_v23  ;;  %v4889_v17 = vpop.f32.mrb[161].mxu0 }
 0xbf0   :  { %v3223_v26 = vpop.f32.mrb[162].mxu0 }
 0xbf1   :  { %v5949_v52 = vadd.f32 %v5943_v22, %v3223_v26  ;;  %v4890_v27 = vpop.f32.mrb[163].mxu0 }
 0xbf6   :  { %v3228_v55 = vpop.f32.mrb[164].mxu0 }
 0xbf7   :  { %v5952_v29 = vadd.f32 %v5943_v22, %v3228_v55  ;;  %v4893_v32 = vpop.f32.mrb[165].mxu0 }
 0xbf8   :  { %v3231_v28 = vpop.f32.mrb[166].mxu0 }
 0xbf9   :  { %v5955_v33 = vadd.f32 %v5943_v22, %v3231_v28  ;;  %v4894_v34 = vpop.f32.mrb[167].mxu0  ;;  %v3657_v22 = vsel %vm688_vm3, %v3602_v13, 0 }
 0xca4   :  { %v3130_v36 = vpop.f32.mrb[120].mxu1 }
 0xca5   :  { %v3131_v37 = vadd.f32 %v4238_v35, %v3130_v36  ;;  %v4869_v38 = vpop.f32.mrb[121].mxu1 }
 0xca6   :  { %v3133_v5 = vpop.f32.mrb[122].mxu1 }
 0xca7   :  { %v3241_v7 = vpack.c.bf16 %v3131_v37, %v3131_v37  ;;  %v3134_v41 = vadd.f32 %v4238_v35, %v3133_v5  ;;  %v4870_v43 = vpop.f32.mrb[123].mxu1 }
 0xca9   :  { %v3251_v45 = vsel %vm324_vm2, %v3241_v7, 0  ;;  %v3242_v42 = vpack.c.bf16 %v3134_v41, %v3134_v41 }
 0xcaa   :  { %4896 = vmatpush3.bf16.xpose.msra.mxu1 %v3251_v45 }
 0xcab   :  { %v3297_v47 = vsel %vm324_vm2, %v3242_v42, 0  ;;  %4907 = vmatprep.subr.bf16.mxu1 %v5194_v1 }
 0xcac   :  { %v3138_v48 = vpop.f32.mrb[124].mxu1  ;;  %4902 = vmatpush3.bf16.xpose.msra.mxu0 %v3297_v47 }
 0xcad   :  { %v3139_v46 = vadd.f32 %v4238_v35, %v3138_v48  ;;  %v4873_v16 = vpop.f32.mrb[125].mxu1  ;;  %4913 = vmatprep.subr.bf16.mxu0 %v5194_v1 }
 0xcae   :  { %v3141_v50 = vpop.f32.mrb[126].mxu1 }
 0xcaf   :  { %v3243_v51 = vpack.c.bf16 %v3139_v46, %v3139_v46  ;;  %v3142_v53 = vadd.f32 %v4238_v35, %v3141_v50  ;;  %v4874_v54 = vpop.f32.mrb[127].mxu1 }
 0xcb1   :  { %v3343_v11 = vsel %vm324_vm2, %v3243_v51, 0  ;;  %v3244_v58 = vpack.c.bf16 %v3142_v53, %v3142_v53  ;;  %4898 = vmatmul.mubr.msk.bf16.vlgmr.msra.gmra.mrb[132].mxu1 %vm324_vm2, %v3235_v44 }
 0xcb2   :  { %4908 = vmatpush3.bf16.xpose.msra.mxu1 %v3343_v11  ;;  %4909 = vmatprep.mubr.msk.bf16.mxu1 %vm5195_vm0, %v5194_v1 }
 0xcb3   :  { %v3389_v60 = vsel %vm324_vm2, %v3244_v58, 0  ;;  %4904 = vmatmul.mubr.msk.bf16.vlgmr.msra.gmra.mrb[168].mxu0 %vm324_vm2, %v3236_v56  ;;  %4919 = vmatprep.subr.bf16.mxu1 %v5194_v1 }
 0xcb4   :  { %v3146_v61 = vpop.f32.mrb[128].mxu1  ;;  %4914 = vmatpush3.bf16.xpose.msra.mxu0 %v3389_v60  ;;  %4915 = vmatprep.mubr.msk.bf16.mxu0 %vm5195_vm0, %v5194_v1 }
 0xcb5   :  { %v3147_v62 = vadd.f32 %v4238_v35, %v3146_v61  ;;  %v4877_v59 = vpop.f32.mrb[129].mxu1  ;;  %4925 = vmatprep.subr.bf16.mxu0 %v5194_v1 }
 0xcb6   :  { %v3149_v4 = vpop.f32.mrb[130].mxu1 }
 0xcb7   :  { %v3245_v24 = vpack.c.bf16 %v3147_v62, %v3147_v62  ;;  %v3150_v0 = vadd.f32 %v4238_v35, %v3149_v4  ;;  %v4878_v3 = vpop.f32.mrb[131].mxu1 }
 0xcb9   :  { %v3435_v8 = vsel %vm324_vm2, %v3245_v24, 0  ;;  %v3246_v30 = vpack.c.bf16 %v3150_v0, %v3150_v0  ;;  %4910 = vmatmul.mubr.msk.bf16.vlgmr.msra.gmra.mrb[136].mxu1 %vm324_vm2, %v3237_v2 }
 0xcba   :  { %4920 = vmatpush3.bf16.xpose.msra.mxu1 %v3435_v8  ;;  %4921 = vmatprep.mubr.msk.bf16.mxu1 %vm5195_vm0, %v5194_v1 }
 0xcbb   :  { %v3481_v10 = vsel %vm324_vm2, %v3246_v30, 0  ;;  %4916 = vmatmul.mubr.msk.bf16.vlgmr.msra.gmra.mrb[172].mxu0 %vm324_vm2, %v3238_v19  ;;  %4931 = vmatprep.subr.bf16.mxu1 %v5194_v1 }
 0xcbc   :  { %4926 = vmatpush3.bf16.xpose.msra.mxu0 %v3481_v10  ;;  %4927 = vmatprep.mubr.msk.bf16.mxu0 %vm5195_vm0, %v5194_v1 }
 0xcbd   :  { %4937 = vmatprep.subr.bf16.mxu0 %v5194_v1 }
 0xcc1   :  { %4922 = vmatmul.mubr.msk.bf16.vlgmr.msra.gmra.mrb[140].mxu1 %vm324_vm2, %v3239_v18 }
 0xcc2   :  { %4932 = vmatpush3.bf16.msra.mxu1 %v3611_v20  ;;  %4933 = vmatprep.mubr.msk.bf16.mxu1 %vm5195_vm0, %v5194_v1 }
 0xcc3   :  { %4928 = vmatmul.mubr.msk.bf16.vlgmr.msra.gmra.mrb[176].mxu0 %vm324_vm2, %v3240_v21  ;;  %4943 = vmatprep.subr.bf16.mxu1 %v5194_v1 }
 0xcc4   :  { %4938 = vmatpush3.bf16.msra.mxu0 %v3657_v22  ;;  %4939 = vmatprep.mubr.msk.bf16.mxu0 %vm5195_vm0, %v5194_v1 }
 0xcc5   :  { %4949 = vmatprep.subr.bf16.mxu0 %v5194_v1 }
 0xd84   :  { %v3287_v15 = vpop.f32.mrb[132].mxu1 }
 0xd85   :  { %v3523_v23 = vmul.f32 0.35355338, %v3287_v15  ;;  %v4899_v17 = vpop.f32.mrb[133].mxu1 }
 0xd86   :  { %v3333_v26 = vpop.f32.mrb[168].mxu0  ;;  %v3290_v27 = vpop.f32.mrb[134].mxu1 }
 0xd87   :  { %v3524_v55 = vmul.f32 0.35355338, %v3333_v26  ;;  %v3529_v32 = vsel %vm324_vm2, %v3523_v23, -inf  ;;  %v4900_v28 = vpop.f32.mrb[135].mxu1  ;;  %v4905_v34 = vpop.f32.mrb[169].mxu0 }
 0xd88   :  { %3530 = vmax.xlane.f32.xlu0 %v3529_v32  ;;  %v3336_v35 = vpop.f32.mrb[170].mxu0 }
 0xd89   :  { %v3532_v36 = vsel %vm324_vm2, %v3524_v55, -inf  ;;  %v4906_v37 = vpop.f32.mrb[171].mxu0 }
 0xd8a   :  { %3533 = vmax.xlane.f32.xlu1 %v3532_v36 }
 0xd8c   :  { %v3379_v38 = vpop.f32.mrb[136].mxu1 }
 0xd8d   :  { %v3525_v5 = vmul.f32 0.35355338, %v3379_v38  ;;  %v4911_v39 = vpop.f32.mrb[137].mxu1  ;;  %v3603_v38 = vpack.c.bf16 %v5946_v25, %v5946_v25 }
 0xd8e   :  { %v3425_v7 = vpop.f32.mrb[172].mxu0  ;;  %v3382_v41 = vpop.f32.mrb[138].mxu1 }
 0xd8f   :  { %v3526_v43 = vmul.f32 0.35355338, %v3425_v7  ;;  %v3535_v45 = vsel %vm324_vm2, %v3525_v5, -inf  ;;  %v4912_v42 = vpop.f32.mrb[139].mxu1  ;;  %v4917_v40 = vpop.f32.mrb[173].mxu0  ;;  %v3604_v7 = vpack.c.bf16 %v5949_v52, %v5949_v52 }
 0xd90   :  { %3536 = vmax.xlane.f32.xlu0 %v3535_v45  ;;  %v3428_v47 = vpop.f32.mrb[174].mxu0  ;;  %v3703_v45 = vsel %vm688_vm3, %v3603_v38, 0 }
 0xd91   :  { %v3538_v48 = vsel %vm324_vm2, %v3526_v43, -inf  ;;  %v4918_v44 = vpop.f32.mrb[175].mxu0  ;;  %v3749_v25 = vsel %vm688_vm3, %v3604_v7, 0 }
 0xd92   :  { %3539 = vmax.xlane.f32.xlu1 %v3538_v48  ;;  %v3605_v48 = vpack.c.bf16 %v5952_v29, %v5952_v29 }
 0xd94   :  { %v3471_v46 = vpop.f32.mrb[140].mxu1 }
 0xd95   :  { %v3527_v16 = vmul.f32 0.35355338, %v3471_v46  ;;  %v4923_v31 = vpop.f32.mrb[141].mxu1 }
 0xd96   :  { %v3517_v50 = vpop.f32.mrb[176].mxu0  ;;  %v3474_v51 = vpop.f32.mrb[142].mxu1 }
 0xd97   :  { %v3528_v53 = vmul.f32 0.35355338, %v3517_v50  ;;  %v3541_v54 = vsel %vm324_vm2, %v3527_v16, -inf  ;;  %v4929_v11 = vpop.f32.mrb[177].mxu0  ;;  %v4924_v56 = vpop.f32.mrb[143].mxu1  ;;  %v3795_v51 = vsel %vm688_vm3, %v3605_v48, 0 }
 0xd98   :  { %3542 = vmax.xlane.f32.xlu0 %v3541_v54  ;;  %v3520_v58 = vpop.f32.mrb[178].mxu0 }
 0xd99   :  { %v3544_v57 = vsel %vm324_vm2, %v3528_v53, -inf  ;;  %v4930_v60 = vpop.f32.mrb[179].mxu0 }
 0xd9a   :  { %3545 = vmax.xlane.f32.xlu1 %v3544_v57  ;;  %v4267_v60 = vld [vmem:[%s6121_s7 + $0xc] sm:$0xf] }
 0xe15   :  { %v3531_v61 = vpop.xlane.xlu0 %3530 }
 0xe16   :  { %v3547_v63 = vsub.f32 %v3523_v23, %v3531_v61  ;;  %v3898_v61 = vsel %vm688_vm3, %v4267_v60, 0 }
 0xe17   :  { %v3534_v2 = vpop.xlane.xlu1 %3533 }
 0xe18   :  { %v3553_v62 = vmul.f32 1.442695, %v3547_v63  ;;  %v3548_v59 = vsub.f32 %v3524_v55, %v3534_v2 }
 0xe1a   :  { %5128 = vpow2.f32 %v3553_v62  ;;  %v3555_v4 = vmul.f32 1.442695, %v3548_v59 }
 0xe1c   :  { %5130 = vpow2.f32 %v3555_v4 }
 0xe1d   :  { %v3537_v24 = vpop.xlane.xlu0 %3536 }
 0xe1e   :  { %v3549_v0 = vsub.f32 %v3525_v5, %v3537_v24 }
 0xe1f   :  { %v3540_v3 = vpop.xlane.xlu1 %3539 }
 0xe20   :  { %v3557_v6 = vmul.f32 1.442695, %v3549_v0  ;;  %v3550_v19 = vsub.f32 %v3526_v43, %v3540_v3 }
 0xe22   :  { %5132 = vpow2.f32 %v3557_v6  ;;  %v3559_v8 = vmul.f32 1.442695, %v3550_v19 }
 0xe24   :  { %v5129_v30 = vpop.eup %5128  ;;  %5134 = vpow2.f32 %v3559_v8 }
 0xe25   :  { %v3543_v9 = vpop.xlane.xlu0 %3542  ;;  %v3565_v14 = vsel %vm324_vm2, %v5129_v30, 0.0 }
 0xe26   :  { %v5131_v10 = vpop.eup %5130  ;;  %v3551_v49 = vsub.f32 %v3527_v16, %v3543_v9  ;;  %3566 = vadd.xlane.f32.xlu0 %v3565_v14  ;;  %v3606_v16 = vpack.c.bf16 %v5955_v33, %v5955_v33 }
 0xe27   :  { %v3546_v18 = vpop.xlane.xlu1 %3545  ;;  %v3568_v12 = vsel %vm324_vm2, %v5131_v10, 0.0 }
 0xe28   :  { %v3561_v13 = vmul.f32 1.442695, %v3551_v49  ;;  %v3552_v20 = vsub.f32 %v3528_v53, %v3546_v18  ;;  %3569 = vadd.xlane.f32.xlu1 %v3568_v12  ;;  %v3841_v29 = vsel %vm688_vm3, %v3606_v16, 0 }
 0xe2a   :  { %5136 = vpow2.f32 %v3561_v13  ;;  %v3563_v21 = vmul.f32 1.442695, %v3552_v20 }
 0xe2c   :  { %v5133_v22 = vpop.eup %5132  ;;  %5138 = vpow2.f32 %v3563_v21 }
 0xe2d   :  { %v3571_v15 = vsel %vm324_vm2, %v5133_v22, 0.0 }
 0xe2e   :  { %v5135_v23 = vpop.eup %5134  ;;  %3572 = vadd.xlane.f32.xlu0 %v3571_v15 }
 0xe2f   :  { %v3574_v17 = vsel %vm324_vm2, %v5135_v23, 0.0 }
 0xe30   :  { %3575 = vadd.xlane.f32.xlu1 %v3574_v17 }
 0xe34   :  { %v5137_v26 = vpop.eup %5136 }
 0xe35   :  { %v3577_v27 = vsel %vm324_vm2, %v5137_v26, 0.0 }
 0xe36   :  { %v5139_v55 = vpop.eup %5138  ;;  %3578 = vadd.xlane.f32.xlu0 %v3577_v27 }
 0xe37   :  { %v3580_v32 = vsel %vm324_vm2, %v5139_v55, 0.0 }
 0xe38   :  { %3581 = vadd.xlane.f32.xlu1 %v3580_v32  ;;  %v5164_v32 = vld [vmem:[%s6114_s0] sm:$0xff] }
 0xeb3   :  { %v3567_v28 = vpop.xlane.xlu0 %3566 }
 0xeb4   :  { %5140 = vrcp.f32 %v3567_v28  ;;  %v5165_v28 = vld [vmem:[%s6114_s0 + $0x8] sm:$0xff] }
 0xeb5   :  { %v3570_v34 = vpop.xlane.xlu1 %3569 }
 0xeb6   :  { %5142 = vrcp.f32 %v3570_v34 }
 0xebb   :  { %v3573_v35 = vpop.xlane.xlu0 %3572 }
 0xebc   :  { %5144 = vrcp.f32 %v3573_v35 }
 0xebd   :  { %v3576_v36 = vpop.xlane.xlu1 %3575 }
 0xebe   :  { %v5141_v37 = vpop.eup %5140  ;;  %5146 = vrcp.f32 %v3576_v36 }
 0xebf   :  { %v3589_v5 = vmul.f32 %v5141_v37, %v5129_v30 }
 0xec0   :  { %v5143_v39 = vpop.eup %5142 }
 0xec1   :  { %v3590_v41 = vmul.f32 %v5143_v39, %v5131_v10  ;;  %v3595_v43 = vpack.c.bf16 %v3589_v5, %v3589_v5 }
 0xec3   :  { %v3579_v42 = vpop.xlane.xlu0 %3578  ;;  %4934 = vmatmul.mubr.msk.bf16.vlgmr.msra.gmra.mrb[144].mxu1 %vm324_vm2, %v3595_v43  ;;  %v3596_v40 = vpack.c.bf16 %v3590_v41, %v3590_v41  ;;  %v5166_v43 = vld [vmem:[%s6114_s0 + $0x10] sm:$0xff] }
 0xec4   :  { %5148 = vrcp.f32 %v3579_v42  ;;  %4944 = vmatpush3.bf16.msra.mxu1 %v3703_v45  ;;  %4945 = vmatprep.mubr.msk.bf16.mxu1 %vm5195_vm0, %v5194_v1  ;;  %v5167_v42 = vld [vmem:[%s6114_s0 + $0x18] sm:$0xff] }
 0xec5   :  { %4940 = vmatmul.mubr.msk.bf16.vlgmr.msra.gmra.mrb[180].mxu0 %vm324_vm2, %v3596_v40  ;;  %v3582_v47 = vpop.xlane.xlu1 %3581  ;;  %4955 = vmatprep.subr.bf16.mxu1 %v5194_v1 }
 0xec6   :  { %v5145_v52 = vpop.eup %5144  ;;  %4950 = vmatpush3.bf16.msra.mxu0 %v3749_v25  ;;  %5150 = vrcp.f32 %v3582_v47  ;;  %4951 = vmatprep.mubr.msk.bf16.mxu0 %vm5195_vm0, %v5194_v1 }
 0xec7   :  { %v3591_v44 = vmul.f32 %v5145_v52, %v5133_v22  ;;  %4961 = vmatprep.subr.bf16.mxu0 %v5194_v1 }
 0xec8   :  { %v5147_v46 = vpop.eup %5146 }
 0xec9   :  { %v3592_v31 = vmul.f32 %v5147_v46, %v5135_v23  ;;  %v3597_v50 = vpack.c.bf16 %v3591_v44, %v3591_v44 }
 0xecb   :  { %4946 = vmatmul.mubr.msk.bf16.vlgmr.msra.gmra.mrb[148].mxu1 %vm324_vm2, %v3597_v50  ;;  %v3598_v53 = vpack.c.bf16 %v3592_v31, %v3592_v31  ;;  %v5168_v50 = vld [vmem:[%s6114_s0 + $0x20] sm:$0xff] }
 0xecc   :  { %4956 = vmatpush3.bf16.msra.mxu1 %v3795_v51  ;;  %4957 = vmatprep.mubr.msk.bf16.mxu1 %vm5195_vm0, %v5194_v1 }
 0xecd   :  { %4952 = vmatmul.mubr.msk.bf16.vlgmr.msra.gmra.mrb[184].mxu0 %vm324_vm2, %v3598_v53  ;;  %4967 = vmatprep.subr.bf16.mxu1 %v5194_v1  ;;  %v5169_v53 = vld [vmem:[%s6114_s0 + $0x28] sm:$0xff] }
 0xece   :  { %v5149_v54 = vpop.eup %5148  ;;  %4962 = vmatpush3.bf16.msra.mxu0 %v3841_v29  ;;  %4963 = vmatprep.mubr.msk.bf16.mxu0 %vm5195_vm0, %v5194_v1 }
 0xecf   :  { %v3593_v33 = vmul.f32 %v5149_v54, %v5137_v26 }
 0xed0   :  { %v5151_v11 = vpop.eup %5150 }
 0xed1   :  { %v3594_v56 = vmul.f32 %v5151_v11, %v5139_v55  ;;  %v3599_v58 = vpack.c.bf16 %v3593_v33, %v3593_v33  ;;  %v4090_v55 = vld [vmem:[%s6122_s8] ss:$0 sm:$0xff] }
 0xed2   :  { %v57_v34 = vadd.f32 %v5165_v28, %v4090_v55  ;;  %v58_v45 = vadd.f32 %v5166_v43, %v4090_v55  ;;  %v59_v40 = vadd.f32 %v5167_v42, %v4090_v55  ;;  %v60_v51 = vadd.f32 %v5168_v50, %v4090_v55 }
 0xed3   :  { %4958 = vmatmul.mubr.msk.bf16.vlgmr.msra.gmra.mrb[152].mxu1 %vm324_vm2, %v3599_v58  ;;  %v3600_v57 = vpack.c.bf16 %v3594_v56, %v3594_v56  ;;  %v61_v29 = vadd.f32 %v5169_v53, %v4090_v55 }
 0xed4   :  { %4969 = vmatprep.mubr.msk.bf16.mxu1 %vm5195_vm0, %v5194_v1  ;;  %4968 = vmatpush3.bf16.msra.mxu1 %v3898_v61 }
 0xed5   :  { %4964 = vmatmul.mubr.msk.bf16.vlgmr.msra.gmra.mrb[188].mxu0 %vm324_vm2, %v3600_v57 }
 0xf96   :  { %v3647_v63 = vpop.f32.mrb[144].mxu1 }
 0xf97   :  { %v4935_v2 = vpop.f32.mrb[145].mxu1 }
 0xf98   :  { %v3650_v62 = vpop.f32.mrb[146].mxu1  ;;  %v3693_v59 = vpop.f32.mrb[180].mxu0 }
 0xf99   :  { %v3883_v4 = vpack.c.bf16 %v3693_v59, %v3647_v63  ;;  %v4936_v24 = vpop.f32.mrb[147].mxu1  ;;  %v4941_v0 = vpop.f32.mrb[181].mxu0 }
 0xf9a   :  { %v3696_v3 = vpop.f32.mrb[182].mxu0 }
 0xf9b   :  { %v4942_v6 = vpop.f32.mrb[183].mxu0  ;;  %4970 = vmatmul.mubr.msk.bf16.vlgmr.msra.gmra.mrb[36].mxu1 %vm324_vm2, %v3883_v4 }
 0xf9c   :  { %4973 = vmatprep.mubr.msk.bf16.mxu1 %vm5195_vm0, %v5194_v1 }
 0xf9e   :  { %v3739_v19 = vpop.f32.mrb[148].mxu1 }
 0xf9f   :  { %v4947_v8 = vpop.f32.mrb[149].mxu1 }
 0xfa0   :  { %v3742_v30 = vpop.f32.mrb[150].mxu1  ;;  %v3785_v9 = vpop.f32.mrb[184].mxu0 }
 0xfa1   :  { %v3884_v14 = vpack.c.bf16 %v3785_v9, %v3739_v19  ;;  %v4948_v10 = vpop.f32.mrb[151].mxu1  ;;  %v4953_v49 = vpop.f32.mrb[185].mxu0 }
 0xfa2   :  { %v3788_v18 = vpop.f32.mrb[186].mxu0 }
 0xfa3   :  { %v4954_v12 = vpop.f32.mrb[187].mxu0  ;;  %4974 = vmatmul.mubr.msk.bf16.gmra.mrb[40].mxu1 %vm324_vm2, %v3884_v14 }
 0xfa4   :  { %4977 = vmatprep.mubr.msk.bf16.mxu1 %vm5195_vm0, %v5194_v1  ;;  %v56_v1 = vadd.f32 %v5164_v32, %v4090_v55 }
 0xfa6   :  { %v3831_v13 = vpop.f32.mrb[152].mxu1 }
 0xfa7   :  { %v4959_v20 = vpop.f32.mrb[153].mxu1 }
 0xfa8   :  { %v3834_v21 = vpop.f32.mrb[154].mxu1  ;;  %v3877_v22 = vpop.f32.mrb[188].mxu0 }
 0xfa9   :  { %v3885_v15 = vpack.c.bf16 %v3877_v22, %v3831_v13  ;;  %v4960_v23 = vpop.f32.mrb[155].mxu1  ;;  %v4965_v17 = vpop.f32.mrb[189].mxu0 }
 0xfaa   :  { %v3880_v26 = vpop.f32.mrb[190].mxu0 }
 0xfab   :  { %v4966_v27 = vpop.f32.mrb[191].mxu0  ;;  %4978 = vmatmul.mubr.msk.bf16.gmra.mrb[44].mxu1 %vm324_vm2, %v3885_v15 }
0x106e   :  { %v3934_v35 = vpop.f32.mrb[36].mxu1 }
0x106f   :  { %v4985_v36 = vadd.f32 %v3934_v35, %v56_v1  ;;  %v4971_v37 = vpop.f32.mrb[37].mxu1 }
0x1070   :  { %v3937_v38 = vpop.f32.mrb[38].mxu1 }
0x1071   :  { %v4986_v5 = vadd.f32 %v3937_v38, %v57_v34  ;;  %v4972_v39 = vpop.f32.mrb[39].mxu1  ;;  %v3963_v7 = vsel %vm85_vm1, %v4985_v36, 0.0 }
0x1072   :  { %3964 = vadd.xlane.f32.xlu0 %v3963_v7 }
0x1073   :  { %v3966_v41 = vsel %vm85_vm1, %v4986_v5, 0.0 }
0x1074   :  { %3967 = vadd.xlane.f32.xlu1 %v3966_v41 }
0x1076   :  { %v3942_v25 = vpop.f32.mrb[40].mxu1 }
0x1077   :  { %v4987_v47 = vadd.f32 %v3942_v25, %v58_v45  ;;  %v4975_v52 = vpop.f32.mrb[41].mxu1 }
0x1078   :  { %v3945_v48 = vpop.f32.mrb[42].mxu1 }
0x1079   :  { %v4988_v44 = vadd.f32 %v3945_v48, %v59_v40  ;;  %v4976_v46 = vpop.f32.mrb[43].mxu1  ;;  %v3969_v16 = vsel %vm85_vm1, %v4987_v47, 0.0  ;;  %v4271_v40 = vld [vmem:[%s6123_s9] ss:$0 sm:$0xff]  ;;  %s5196_s9 = smov [#allocation2]  }
0x107a   :  { %3970 = vadd.xlane.f32.xlu0 %v3969_v16  ;;  %v4272_v48 = vld [vmem:[%s6124_s10] ss:$0 sm:$0xff]  ;;  %s4079_s10 = sshll.u32 %s5196_s9, 4  ;;  %s4080_s10 = int_to_ptr.vmem [resolvable:$true] %s4079_s10 }
0x107b   :  { %v3972_v31 = vsel %vm85_vm1, %v4988_v44, 0.0  ;;  %s5170_s21 = scalar_lea.vmem %s4080_s10, 768  ;;  %p5175_p1 = scmp.lt.s32.totalorder %s4080_s10, %s4080_s10 }
0x107c   :  { %3973 = vadd.xlane.f32.xlu1 %v3972_v31  ;;  %p5171_p0 = scmp.ne.s32.totalorder %s4080_s10, %s5170_s21  ;;  %p5176_p2 = scmp.lt.s32.totalorder %s5170_s21, %s5170_s21 }
0x107e   :  { %v3950_v54 = vpop.f32.mrb[44].mxu1  ;;  %p5177_p3 = por %p5176_p2, %p5175_p1 }
0x107f   :  { %v4989_v33 = vadd.f32 %v3950_v54, %v60_v51  ;;  %v4979_v11 = vpop.f32.mrb[45].mxu1 }
0x1080   :  { %v3953_v56 = vpop.f32.mrb[46].mxu1  ;;  %p5178_p4 = pnand %p5177_p3, %p5171_p0 }
0x1081   :  { %v4990_v58 = vadd.f32 %v3953_v56, %v61_v29  ;;  %v4980_v57 = vpop.f32.mrb[47].mxu1  ;;  %v3975_v60 = vsel %vm85_vm1, %v4989_v33, 0.0 }
0x1082   :  { %3976 = vadd.xlane.f32.xlu0 %v3975_v60 }
0x1083   :  { %v3978_v61 = vsel %vm85_vm1, %v4990_v58, 0.0 }
0x1084   :  { %3979 = vadd.xlane.f32.xlu1 %v3978_v61 }
0x10ff   :  { %v3965_v63 = vpop.xlane.xlu0 %3964 }
0x1100   :  { %v3982_v2 = vmul.f32 0.03125, %v3965_v63 }
0x1101   :  { %v3968_v62 = vpop.xlane.xlu1 %3967 }
0x1102   :  { %v3988_v59 = vsub.f32 %v4985_v36, %v3982_v2  ;;  %v3983_v4 = vmul.f32 0.03125, %v3968_v62 }
0x1104   :  { %v3989_v24 = vsub.f32 %v4986_v5, %v3983_v4  ;;  %v3994_v0 = vmul.f32 %v3988_v59, %v3988_v59 }
0x1106   :  { %v4000_v3 = vsel %vm85_vm1, %v3994_v0, 0.0  ;;  %v3995_v6 = vmul.f32 %v3989_v24, %v3989_v24 }
0x1107   :  { %v3971_v19 = vpop.xlane.xlu0 %3970  ;;  %4001 = vadd.xlane.f32.xlu0 %v4000_v3 }
0x1108   :  { %v3984_v8 = vmul.f32 0.03125, %v3971_v19  ;;  %v4003_v30 = vsel %vm85_vm1, %v3995_v6, 0.0 }
0x1109   :  { %v3974_v9 = vpop.xlane.xlu1 %3973  ;;  %4004 = vadd.xlane.f32.xlu1 %v4003_v30 }
0x110a   :  { %v3990_v14 = vsub.f32 %v4987_v47, %v3984_v8  ;;  %v3985_v10 = vmul.f32 0.03125, %v3974_v9 }
0x110c   :  { %v3991_v49 = vsub.f32 %v4988_v44, %v3985_v10  ;;  %v3996_v18 = vmul.f32 %v3990_v14, %v3990_v14 }
0x110e   :  { %v4006_v12 = vsel %vm85_vm1, %v3996_v18, 0.0  ;;  %v3997_v13 = vmul.f32 %v3991_v49, %v3991_v49 }
0x110f   :  { %4007 = vadd.xlane.f32.xlu0 %v4006_v12  ;;  %v3977_v20 = vpop.xlane.xlu0 %3976 }
0x1110   :  { %v3986_v21 = vmul.f32 0.03125, %v3977_v20  ;;  %v4009_v22 = vsel %vm85_vm1, %v3997_v13, 0.0 }
0x1111   :  { %4010 = vadd.xlane.f32.xlu1 %v4009_v22  ;;  %v3980_v15 = vpop.xlane.xlu1 %3979 }
0x1112   :  { %v3992_v23 = vsub.f32 %v4989_v33, %v3986_v21  ;;  %v3987_v17 = vmul.f32 0.03125, %v3980_v15 }
0x1114   :  { %v3993_v26 = vsub.f32 %v4990_v58, %v3987_v17  ;;  %v3998_v27 = vmul.f32 %v3992_v23, %v3992_v23 }
0x1116   :  { %v4012_v55 = vsel %vm85_vm1, %v3998_v27, 0.0  ;;  %v3999_v32 = vmul.f32 %v3993_v26, %v3993_v26 }
0x1117   :  { %4013 = vadd.xlane.f32.xlu0 %v4012_v55 }
0x1118   :  { %v4015_v1 = vsel %vm85_vm1, %v3999_v32, 0.0 }
0x1119   :  { %4016 = vadd.xlane.f32.xlu1 %v4015_v1 }
0x1194   :  { %v4002_v28 = vpop.xlane.xlu0 %4001 }
0x1195   :  { %v4018_v34 = vmul.f32 0.03125, %v4002_v28 }
0x1196   :  { %v4005_v35 = vpop.xlane.xlu1 %4004 }
0x1197   :  { %v4024_v36 = vadd.f32 1e-05, %v4018_v34  ;;  %v4019_v37 = vmul.f32 0.03125, %v4005_v35 }
0x1199   :  { %5152 = vrsqrt.f32 %v4024_v36  ;;  %v4025_v38 = vadd.f32 1e-05, %v4019_v37 }
0x119b   :  { %5154 = vrsqrt.f32 %v4025_v38 }
0x119c   :  { %v4008_v5 = vpop.xlane.xlu0 %4007 }
0x119d   :  { %v4020_v39 = vmul.f32 0.03125, %v4008_v5 }
0x119e   :  { %v4011_v7 = vpop.xlane.xlu1 %4010 }
0x119f   :  { %v4026_v41 = vadd.f32 1e-05, %v4020_v39  ;;  %v4021_v43 = vmul.f32 0.03125, %v4011_v7 }
0x11a1   :  { %5156 = vrsqrt.f32 %v4026_v41  ;;  %v4027_v45 = vadd.f32 1e-05, %v4021_v43 }
0x11a3   :  { %v5153_v42 = vpop.eup %5152  ;;  %5158 = vrsqrt.f32 %v4027_v45 }
0x11a4   :  { %v4036_v25 = vmul.f32 %v5153_v42, %v3988_v59  ;;  %v4014_v47 = vpop.xlane.xlu0 %4013 }
0x11a5   :  { %v5155_v52 = vpop.eup %5154  ;;  %v4022_v44 = vmul.f32 0.03125, %v4014_v47 }
0x11a6   :  { %v4049_v46 = vmul.f32 %v4271_v40, %v4036_v25  ;;  %v4037_v16 = vmul.f32 %v5155_v52, %v3989_v24  ;;  %v4017_v31 = vpop.xlane.xlu1 %4016 }
0x11a7   :  { %v4028_v50 = vadd.f32 1e-05, %v4022_v44  ;;  %v4023_v51 = vmul.f32 0.03125, %v4017_v31 }
0x11a8   :  { %v4062_v53 = vadd.f32 %v4272_v48, %v4049_v46  ;;  %v4050_v29 = vmul.f32 %v4271_v40, %v4037_v16 }
0x11a9   :  { %5160 = vrsqrt.f32 %v4028_v50  ;;  %v4029_v54 = vadd.f32 1e-05, %v4023_v51 }
0x11aa   :  { %4068 = vst.msk [vmem:[#allocation2] sm:$0xff] %vm85_vm1, %v4062_v53  ;;  %v4063_v33 = vadd.f32 %v4272_v48, %v4050_v29 }
0x11ab   :  { %v5157_v11 = vpop.eup %5156  ;;  %5162 = vrsqrt.f32 %v4029_v54 }
0x11ac   :  { %4069 = vst.msk [vmem:[#allocation2 + $0x8] sm:$0xff] %vm85_vm1, %v4063_v33  ;;  %v4038_v56 = vmul.f32 %v5157_v11, %v3990_v14 }
0x11ad   :  { %v5159_v58 = vpop.eup %5158 }
0x11ae   :  { %v4051_v57 = vmul.f32 %v4271_v40, %v4038_v56  ;;  %v4039_v60 = vmul.f32 %v5159_v58, %v3991_v49 }
0x11b0   :  { %v4064_v61 = vadd.f32 %v4272_v48, %v4051_v57  ;;  %v4052_v63 = vmul.f32 %v4271_v40, %v4039_v60 }
0x11b2   :  { %4070 = vst.msk [vmem:[#allocation2 + $0x10] sm:$0xff] %vm85_vm1, %v4064_v61  ;;  %v4065_v2 = vadd.f32 %v4272_v48, %v4052_v63 }
0x11b3   :  { %v5161_v62 = vpop.eup %5160 }
0x11b4   :  { %4071 = vst.msk [vmem:[#allocation2 + $0x18] sm:$0xff] %vm85_vm1, %v4065_v2  ;;  %v4040_v59 = vmul.f32 %v5161_v62, %v3992_v23 }
0x11b5   :  { %v5163_v4 = vpop.eup %5162 }
0x11b6   :  { %v4053_v24 = vmul.f32 %v4271_v40, %v4040_v59  ;;  %v4041_v0 = vmul.f32 %v5163_v4, %v3993_v26 }
0x11b8   :  { %v4066_v3 = vadd.f32 %v4272_v48, %v4053_v24  ;;  %v4054_v6 = vmul.f32 %v4271_v40, %v4041_v0 }
0x11ba   :  { %4072 = vst.msk [vmem:[#allocation2 + $0x20] sm:$0xff] %vm85_vm1, %v4066_v3  ;;  %v4067_v19 = vadd.f32 %v4272_v48, %v4054_v6 }
0x11bc   :  { %4073 = vst.msk [vmem:[#allocation2 + $0x28] sm:$0xff] %vm85_vm1, %v4067_v19 }
0x11bd   :  { %5181 = shalt.err (!%p5178_p4)
}
0x11be   :  { %s5182_s23 = scalar_lea.hbm %s6125_s11, 768 }
0x11bf   :  { %p5183_p5 = scmp.ne.s32.totalorder %s6125_s11, %s5182_s23  ;;  %p5186_p6 = scmp.lt.u32.totalorder %s5182_s23, %s6125_s11 }
0x11c1   :  { %p5188_p7 = pnand %p5186_p6, %p5183_p5 }
0x11c3   :  { %5191 = shalt.err (!%p5188_p7)
}
0x11c4   :  { %s5197_s4 = smov 128   ;;  %s5198_s5 = smov 8  }
0x11c5   :  { %4085 = dma.vmem_to_hbm [thread:$0]  %s4080_s10, 768, %s6125_s11, [#allocation3], %s5197_s4, %s5197_s4, %s5198_s5  }
0x11c6   :  { %5192 = dma.done.wait [#allocation3], 768  }
0x11c7   :  { %5193 = vsyncadd [#allocation3], 4294966528 }
0x11c8   :  { %4089 = vsyncpa [#allocation3], 1 }

</bundles_post_ra>
